<compile_context>
chip_gen: v5e
topology: v5e:2x2
jax: 0.10.0
libtpu: 0.0.40
codegen_flags: <defaults>
</compile_context>

<pallas_src>
import jax
import jax.numpy as jnp
from jax import lax
from jax.experimental import pallas as pl
from jax.experimental.pallas import tpu as pltpu

LANE = 128


def _round_up(x, m):
    return ((x + m - 1) // m) * m


def _pad_to(x, shape, fill=0.0):
    out = jnp.full(shape, fill, x.dtype)
    return out.at[tuple(slice(0, s) for s in x.shape)].set(x)


def gru_decode_kernel(tok_ref,                      # (T,) int32, SMEM
                      emb_ref,                      # (O, Hp) relu(embedding), VMEM-resident
                      h0_ref,                       # (1, Hp) initial hidden
                      w_ih_ref, w_hh_ref,           # (Hp, 3Hp) fused per-gate, pre-transposed
                      b_gi_ref,                     # (1, 3Hp) [b_ih_r+b_hh_r | b_ih_z+b_hh_z | b_ih_n]
                      b_hn_ref,                     # (1, Hp)  b_hh_n
                      w_out_ref, b_out_ref,         # (Hp, Op), (1, Op) (-1e30 in pad cols)
                      logp_ref, h_final_ref,        # outputs: (T, Op), (1, Hp)
                      x_all, gi_all, h_all):        # VMEM scratch: (T,Hp), (T,3Hp), (T,Hp)
    T, Hp = x_all.shape

    # ---- prologue: gather relu(emb) rows for all T tokens (table stays in VMEM)
    def gather(t, c):
        x_all[pl.ds(t, 1), :] = emb_ref[pl.ds(tok_ref[t], 1), :]
        return c
    lax.fori_loop(0, T, gather, 0, unroll=True)

    # ---- hoisted x-side GEMM: all steps, all gates at once (biases pre-folded)
    gi_all[...] = (jnp.dot(x_all[...], w_ih_ref[...],
                           preferred_element_type=jnp.float32)
                   + b_gi_ref[...])

    b_hn = b_hn_ref[...]

    # ---- sequential recurrence: a single fused MXU push per step
    def step(t, h):
        gh = jnp.dot(h, w_hh_ref[...], preferred_element_type=jnp.float32)
        gi = gi_all[pl.ds(t, 1), :]
        r = jax.nn.sigmoid(gi[:, 0:Hp] + gh[:, 0:Hp])
        z = jax.nn.sigmoid(gi[:, Hp:2 * Hp] + gh[:, Hp:2 * Hp])
        n = jnp.tanh(gi[:, 2 * Hp:3 * Hp] + r * (gh[:, 2 * Hp:3 * Hp] + b_hn))
        h_new = (1.0 - z) * n + z * h
        h_all[pl.ds(t, 1), :] = h_new
        return h_new

    h_last = lax.fori_loop(0, T, step, h0_ref[...], unroll=True)
    h_final_ref[...] = h_last

    # ---- deferred output head: batched Linear + LogSoftmax over all T steps
    logits = (jnp.dot(h_all[...], w_out_ref[...],
                      preferred_element_type=jnp.float32)
              + b_out_ref[...])                      # pad cols carry -1e30 bias
    m = jnp.max(logits, axis=-1, keepdims=True)
    shifted = logits - m
    lse = jnp.log(jnp.sum(jnp.exp(shifted), axis=-1, keepdims=True))
    logp_ref[...] = shifted - lse


@jax.jit
def gru_decode(tokens, emb_relu, h0, w_ih, w_hh, b_gi, b_hn, w_out, b_out):
    """Fused T-step teacher-forced decode in a single (grid-less) pallas_call."""
    T = tokens.shape[0]
    Hp = h0.shape[-1]
    Op = w_out.shape[-1]

    flops = (2 * T * Hp * 3 * Hp          # hoisted input GEMM
             + 2 * T * Hp * 3 * Hp        # recurrent GEMMs
             + 2 * T * Hp * Op            # output head
             + 16 * T * Hp + 4 * T * Op)  # elementwise / softmax
    transcendentals = T * (3 * Hp + Op)   # sigmoid/tanh + exp
    bytes_accessed = 4 * (tokens.size + emb_relu.size + h0.size + w_ih.size
                          + w_hh.size + b_gi.size + b_hn.size + w_out.size
                          + b_out.size + T * Op + Hp)

    vmem = pl.BlockSpec(memory_space=pltpu.MemorySpace.VMEM)
    return pl.pallas_call(
        gru_decode_kernel,
        out_shape=(jax.ShapeDtypeStruct((T, Op), jnp.float32),
                   jax.ShapeDtypeStruct((1, Hp), jnp.float32)),
        in_specs=[
            pl.BlockSpec(memory_space=pltpu.MemorySpace.SMEM),   # token ids
            vmem, vmem, vmem, vmem, vmem, vmem, vmem, vmem,
        ],
        out_specs=(vmem, vmem),
        scratch_shapes=[pltpu.VMEM((T, Hp), jnp.float32),        # x_all
                        pltpu.VMEM((T, 3 * Hp), jnp.float32),    # gi_all
                        pltpu.VMEM((T, Hp), jnp.float32)],       # h_all
        cost_estimate=pl.CostEstimate(flops=int(flops),
                                      transcendentals=int(transcendentals),
                                      bytes_accessed=int(bytes_accessed)),
    )(tokens, emb_relu, h0, w_ih, w_hh, b_gi, b_hn, w_out, b_out)


class DecoderRNNPallas:
    """JAX/Pallas port of the PyTorch DecoderRNN forward pass."""

    def __init__(self, hidden_size, output_size, key):
        H, O = hidden_size, output_size
        self.hidden_size, self.output_size = H, O
        Hp, Op = _round_up(H, LANE), _round_up(O, LANE)
        self.H_pad, self.O_pad = Hp, Op

        ks = jax.random.split(key, 7)
        bound = 1.0 / (H ** 0.5)

        # PyTorch-style parameters (kept unpadded for the pure-JAX reference).
        emb = jax.random.normal(ks[0], (O, H), jnp.float32)                    # nn.Embedding
        w_ih = jax.random.uniform(ks[1], (3 * H, H), jnp.float32, -bound, bound)
        w_hh = jax.random.uniform(ks[2], (3 * H, H), jnp.float32, -bound, bound)
        b_ih = jax.random.uniform(ks[3], (3 * H,), jnp.float32, -bound, bound)
        b_hh = jax.random.uniform(ks[4], (3 * H,), jnp.float32, -bound, bound)
        w_out = jax.random.uniform(ks[5], (O, H), jnp.float32, -bound, bound)   # nn.Linear
        b_out = jax.random.uniform(ks[6], (O,), jnp.float32, -bound, bound)
        self._emb, self._w_ih, self._w_hh = emb, w_ih, w_hh
        self._b_ih, self._b_hh, self._w_out, self._b_out = b_ih, b_hh, w_out, b_out

        # --- kernel-facing layouts: lane-padded, per-gate fused, pre-transposed ---
        # relu(embedding) precomputed once (loop-invariant).
        self.emb_relu = _pad_to(jnp.maximum(emb, 0.0), (O, Hp))
        # Fused (Hp, 3Hp) gate weights; each gate occupies its own 128-lane block.
        self.w_ih_p = jnp.concatenate(
            [_pad_to(w_ih[g * H:(g + 1) * H].T, (Hp, Hp)) for g in range(3)], axis=1)
        self.w_hh_p = jnp.concatenate(
            [_pad_to(w_hh[g * H:(g + 1) * H].T, (Hp, Hp)) for g in range(3)], axis=1)
        # Pre-folded biases: r/z gates only ever see b_ih+b_hh; n keeps b_ih only,
        # b_hh_n stays separate (it sits inside the r * (.) term).
        b_r = (b_ih[0:H] + b_hh[0:H]).reshape(1, H)
        b_z = (b_ih[H:2 * H] + b_hh[H:2 * H]).reshape(1, H)
        b_ni = b_ih[2 * H:3 * H].reshape(1, H)
        self.b_gi = jnp.concatenate(
            [_pad_to(b_r, (1, Hp)), _pad_to(b_z, (1, Hp)), _pad_to(b_ni, (1, Hp))],
            axis=1)
        self.b_hn = _pad_to(b_hh[2 * H:3 * H].reshape(1, H), (1, Hp))
        self.w_out_t = _pad_to(w_out.T, (Hp, Op))
        # padded logit columns get -1e30 so log-softmax ignores them
        self.b_out_p = jnp.full((1, Op), -1e30, jnp.float32).at[:, :O].set(b_out)

    def init_hidden(self):
        return jnp.zeros((1, 1, self.hidden_size), jnp.float32)

    def decode(self, tokens, hidden):
        """Teacher-forced decode of a whole token sequence in one kernel launch."""
        tokens = jnp.asarray(tokens, jnp.int32).reshape(-1)
        h0 = _pad_to(jnp.asarray(hidden, jnp.float32).reshape(1, self.hidden_size),
                     (1, self.H_pad))
        logp_p, h_p = gru_decode(tokens, self.emb_relu, h0,
                                 self.w_ih_p, self.w_hh_p, self.b_gi, self.b_hn,
                                 self.w_out_t, self.b_out_p)
        logp = logp_p[:, :self.output_size]
        h_new = h_p[:, :self.hidden_size].reshape(1, 1, self.hidden_size)
        return logp, h_new

    def __call__(self, token, hidden):
        """Single decoder step — same semantics as DecoderRNN.forward."""
        logp, h_new = self.decode(jnp.reshape(jnp.asarray(token, jnp.int32), (1,)),
                                  hidden)
        return logp, h_new   # (1, O) log-probs, (1, 1, H) hidden


def _reference_decode(model, tokens, hidden):
    """Pure-JAX reference of the same teacher-forced decode (unpadded math)."""
    H = model.hidden_size
    h = jnp.asarray(hidden, jnp.float32).reshape(1, H)
    outs = []
    for t in range(tokens.shape[0]):
        x = jnp.maximum(model._emb[tokens[t]], 0.0).reshape(1, H)
        gi = x @ model._w_ih.T + model._b_ih
        gh = h @ model._w_hh.T + model._b_hh
        i_r, i_z, i_n = jnp.split(gi, 3, axis=1)
        h_r, h_z, h_n = jnp.split(gh, 3, axis=1)
        r = jax.nn.sigmoid(i_r + h_r)
        z = jax.nn.sigmoid(i_z + h_z)
        n = jnp.tanh(i_n + r * h_n)
        h = (1.0 - z) * n + z * h
        logits = h @ model._w_out.T + model._b_out
        outs.append(jax.nn.log_softmax(logits, axis=-1))
    return jnp.concatenate(outs, axis=0), h.reshape(1, 1, H)


if __name__ == "__main__":
    hidden_size, output_size, seq_len = 32, 64, 8

    key = jax.random.PRNGKey(0)
    model = DecoderRNNPallas(hidden_size, output_size, key)

    k1, k2 = jax.random.split(jax.random.PRNGKey(1))
    tokens = jax.random.randint(k1, (seq_len,), 0, output_size, jnp.int32)
    hidden = jax.random.normal(k2, (1, 1, hidden_size), jnp.float32)

    # Fused T-step decode: ONE grid-less pallas_call for the whole sequence.
    log_probs, h_final = model.decode(tokens, hidden)
    jax.block_until_ready((log_probs, h_final))

    assert log_probs.shape == (seq_len, output_size)
    assert h_final.shape == (1, 1, hidden_size)
    # log-softmax sanity: probabilities sum to 1 at every step
    assert jnp.allclose(jnp.sum(jnp.exp(log_probs), axis=-1), 1.0, atol=1e-3)

    # Per-step path (original forward semantics) must chain to the same result.
    h = hidden
    step_logps = []
    for t in range(seq_len):
        lp, h = model(tokens[t].reshape(1, 1), h)
        step_logps.append(lp)
    step_logps = jnp.concatenate(step_logps, axis=0)
    jax.block_until_ready((step_logps, h))
    assert jnp.allclose(step_logps, log_probs, atol=1e-5, rtol=1e-5)
    assert jnp.allclose(h, h_final, atol=1e-5, rtol=1e-5)

    # Cross-check against a pure-JAX reference (loose tol vs MXU summation order).
    ref_logps, ref_h = _reference_decode(model, tokens, hidden)
    assert jnp.allclose(log_probs, ref_logps, atol=2e-2, rtol=2e-2)
    assert jnp.allclose(h_final, ref_h, atol=2e-2, rtol=2e-2)

    print("KERNEL_OK")
</pallas_src>

<mosaic_0001>
module attributes {stable_mosaic.version = 11 : i64} {
  func.func @gru_decode_kernel(%arg0: memref<8xi32, #tpu.memory_space<smem>>, %arg1: memref<64x128xf32, #tpu.memory_space<vmem>>, %arg2: memref<1x128xf32, #tpu.memory_space<vmem>>, %arg3: memref<128x384xf32, #tpu.memory_space<vmem>>, %arg4: memref<128x384xf32, #tpu.memory_space<vmem>>, %arg5: memref<1x384xf32, #tpu.memory_space<vmem>>, %arg6: memref<1x128xf32, #tpu.memory_space<vmem>>, %arg7: memref<128x128xf32, #tpu.memory_space<vmem>>, %arg8: memref<1x128xf32, #tpu.memory_space<vmem>>, %arg9: memref<8x128xf32, #tpu.memory_space<vmem>>, %arg10: memref<1x128xf32, #tpu.memory_space<vmem>>, %arg11: memref<8x128xf32, #tpu.memory_space<vmem>>, %arg12: memref<8x384xf32, #tpu.memory_space<vmem>>, %arg13: memref<8x128xf32, #tpu.memory_space<vmem>>) attributes {dimension_semantics = [], scalar_prefetch = 0 : i64, scratch_operands = 3 : i64, tpu.core_type = #tpu.core_type<tc>} {
    %c0_i32 = arith.constant 0 : i32
    %0 = arith.index_cast %c0_i32 : i32 to index
    %1 = memref.load %arg0[%0] : memref<8xi32, #tpu.memory_space<smem>>
    %2 = arith.index_cast %1 : i32 to index
    %c0 = arith.constant 0 : index
    %3 = vector.load %arg1[%2, %c0] : memref<64x128xf32, #tpu.memory_space<vmem>>, vector<1x128xf32>
    %4 = arith.index_cast %c0_i32 : i32 to index
    %c0_0 = arith.constant 0 : index
    %5 = vector.load %arg11[%4, %c0_0] : memref<8x128xf32, #tpu.memory_space<vmem>>, vector<1x128xf32>
    tpu.vector_store %arg11[%4, %c0_0], %3 {strides = array<i32>} : memref<8x128xf32, #tpu.memory_space<vmem>>, vector<1x128xf32>,
    %c1_i32 = arith.constant 1 : i32
    %6 = arith.index_cast %c1_i32 : i32 to index
    %7 = memref.load %arg0[%6] : memref<8xi32, #tpu.memory_space<smem>>
    %8 = arith.index_cast %7 : i32 to index
    %c0_1 = arith.constant 0 : index
    %9 = vector.load %arg1[%8, %c0_1] : memref<64x128xf32, #tpu.memory_space<vmem>>, vector<1x128xf32>
    %10 = arith.index_cast %c1_i32 : i32 to index
    %c0_2 = arith.constant 0 : index
    %11 = vector.load %arg11[%10, %c0_2] : memref<8x128xf32, #tpu.memory_space<vmem>>, vector<1x128xf32>
    tpu.vector_store %arg11[%10, %c0_2], %9 {strides = array<i32>} : memref<8x128xf32, #tpu.memory_space<vmem>>, vector<1x128xf32>,
    %c2_i32 = arith.constant 2 : i32
    %12 = arith.index_cast %c2_i32 : i32 to index
    %13 = memref.load %arg0[%12] : memref<8xi32, #tpu.memory_space<smem>>
    %14 = arith.index_cast %13 : i32 to index
    %c0_3 = arith.constant 0 : index
    %15 = vector.load %arg1[%14, %c0_3] : memref<64x128xf32, #tpu.memory_space<vmem>>, vector<1x128xf32>
    %16 = arith.index_cast %c2_i32 : i32 to index
    %c0_4 = arith.constant 0 : index
    %17 = vector.load %arg11[%16, %c0_4] : memref<8x128xf32, #tpu.memory_space<vmem>>, vector<1x128xf32>
    tpu.vector_store %arg11[%16, %c0_4], %15 {strides = array<i32>} : memref<8x128xf32, #tpu.memory_space<vmem>>, vector<1x128xf32>,
    %c3_i32 = arith.constant 3 : i32
    %18 = arith.index_cast %c3_i32 : i32 to index
    %19 = memref.load %arg0[%18] : memref<8xi32, #tpu.memory_space<smem>>
    %20 = arith.index_cast %19 : i32 to index
    %c0_5 = arith.constant 0 : index
    %21 = vector.load %arg1[%20, %c0_5] : memref<64x128xf32, #tpu.memory_space<vmem>>, vector<1x128xf32>
    %22 = arith.index_cast %c3_i32 : i32 to index
    %c0_6 = arith.constant 0 : index
    %23 = vector.load %arg11[%22, %c0_6] : memref<8x128xf32, #tpu.memory_space<vmem>>, vector<1x128xf32>
    tpu.vector_store %arg11[%22, %c0_6], %21 {strides = array<i32>} : memref<8x128xf32, #tpu.memory_space<vmem>>, vector<1x128xf32>,
    %c4_i32 = arith.constant 4 : i32
    %24 = arith.index_cast %c4_i32 : i32 to index
    %25 = memref.load %arg0[%24] : memref<8xi32, #tpu.memory_space<smem>>
    %26 = arith.index_cast %25 : i32 to index
    %c0_7 = arith.constant 0 : index
    %27 = vector.load %arg1[%26, %c0_7] : memref<64x128xf32, #tpu.memory_space<vmem>>, vector<1x128xf32>
    %28 = arith.index_cast %c4_i32 : i32 to index
    %c0_8 = arith.constant 0 : index
    %29 = vector.load %arg11[%28, %c0_8] : memref<8x128xf32, #tpu.memory_space<vmem>>, vector<1x128xf32>
    tpu.vector_store %arg11[%28, %c0_8], %27 {strides = array<i32>} : memref<8x128xf32, #tpu.memory_space<vmem>>, vector<1x128xf32>,
    %c5_i32 = arith.constant 5 : i32
    %30 = arith.index_cast %c5_i32 : i32 to index
    %31 = memref.load %arg0[%30] : memref<8xi32, #tpu.memory_space<smem>>
    %32 = arith.index_cast %31 : i32 to index
    %c0_9 = arith.constant 0 : index
    %33 = vector.load %arg1[%32, %c0_9] : memref<64x128xf32, #tpu.memory_space<vmem>>, vector<1x128xf32>
    %34 = arith.index_cast %c5_i32 : i32 to index
    %c0_10 = arith.constant 0 : index
    %35 = vector.load %arg11[%34, %c0_10] : memref<8x128xf32, #tpu.memory_space<vmem>>, vector<1x128xf32>
    tpu.vector_store %arg11[%34, %c0_10], %33 {strides = array<i32>} : memref<8x128xf32, #tpu.memory_space<vmem>>, vector<1x128xf32>,
    %c6_i32 = arith.constant 6 : i32
    %36 = arith.index_cast %c6_i32 : i32 to index
    %37 = memref.load %arg0[%36] : memref<8xi32, #tpu.memory_space<smem>>
    %38 = arith.index_cast %37 : i32 to index
    %c0_11 = arith.constant 0 : index
    %39 = vector.load %arg1[%38, %c0_11] : memref<64x128xf32, #tpu.memory_space<vmem>>, vector<1x128xf32>
    %40 = arith.index_cast %c6_i32 : i32 to index
    %c0_12 = arith.constant 0 : index
    %41 = vector.load %arg11[%40, %c0_12] : memref<8x128xf32, #tpu.memory_space<vmem>>, vector<1x128xf32>
    tpu.vector_store %arg11[%40, %c0_12], %39 {strides = array<i32>} : memref<8x128xf32, #tpu.memory_space<vmem>>, vector<1x128xf32>,
    %c7_i32 = arith.constant 7 : i32
    %42 = arith.index_cast %c7_i32 : i32 to index
    %43 = memref.load %arg0[%42] : memref<8xi32, #tpu.memory_space<smem>>
    %44 = arith.index_cast %43 : i32 to index
    %c0_13 = arith.constant 0 : index
    %45 = vector.load %arg1[%44, %c0_13] : memref<64x128xf32, #tpu.memory_space<vmem>>, vector<1x128xf32>
    %46 = arith.index_cast %c7_i32 : i32 to index
    %c0_14 = arith.constant 0 : index
    %47 = vector.load %arg11[%46, %c0_14] : memref<8x128xf32, #tpu.memory_space<vmem>>, vector<1x128xf32>
    tpu.vector_store %arg11[%46, %c0_14], %45 {strides = array<i32>} : memref<8x128xf32, #tpu.memory_space<vmem>>, vector<1x128xf32>,
    %c8_i32 = arith.constant 8 : i32
    %c0_15 = arith.constant 0 : index
    %c0_16 = arith.constant 0 : index
    %48 = vector.load %arg11[%c0_15, %c0_16] : memref<8x128xf32, #tpu.memory_space<vmem>>, vector<8x128xf32>
    %c0_17 = arith.constant 0 : index
    %c0_18 = arith.constant 0 : index
    %49 = vector.load %arg3[%c0_17, %c0_18] : memref<128x384xf32, #tpu.memory_space<vmem>>, vector<128x384xf32>
    %cst = arith.constant dense<0.000000e+00> : vector<8x384xf32>
    %50 = tpu.matmul %48, %49, %cst {dimension_numbers = #tpu.dot_dimension_numbers<[1], [0], [0], [1], [0, 0, 1, 1], [], []>} : vector<8x128xf32>, vector<128x384xf32>, vector<8x384xf32> -> vector<8x384xf32>
    %c0_19 = arith.constant 0 : index
    %c0_20 = arith.constant 0 : index
    %51 = vector.load %arg5[%c0_19, %c0_20] : memref<1x384xf32, #tpu.memory_space<vmem>>, vector<1x384xf32>
    %52 = vector.broadcast %51 : vector<1x384xf32> to vector<8x384xf32>
    %53 = arith.addf %50, %52 : vector<8x384xf32>
    %c0_21 = arith.constant 0 : index
    %c0_22 = arith.constant 0 : index
    %54 = vector.load %arg12[%c0_21, %c0_22] : memref<8x384xf32, #tpu.memory_space<vmem>>, vector<8x384xf32>
    tpu.vector_store %arg12[%c0_21, %c0_22], %53 {strides = array<i32>} : memref<8x384xf32, #tpu.memory_space<vmem>>, vector<8x384xf32>,
    %c0_23 = arith.constant 0 : index
    %c0_24 = arith.constant 0 : index
    %55 = vector.load %arg6[%c0_23, %c0_24] : memref<1x128xf32, #tpu.memory_space<vmem>>, vector<1x128xf32>
    %c0_25 = arith.constant 0 : index
    %c0_26 = arith.constant 0 : index
    %56 = vector.load %arg2[%c0_25, %c0_26] : memref<1x128xf32, #tpu.memory_space<vmem>>, vector<1x128xf32>
    %c0_i32_27 = arith.constant 0 : i32
    %c0_28 = arith.constant 0 : index
    %c0_29 = arith.constant 0 : index
    %57 = vector.load %arg4[%c0_28, %c0_29] : memref<128x384xf32, #tpu.memory_space<vmem>>, vector<128x384xf32>
    %cst_30 = arith.constant dense<0.000000e+00> : vector<1x384xf32>
    %58 = tpu.matmul %56, %57, %cst_30 {dimension_numbers = #tpu.dot_dimension_numbers<[1], [0], [0], [1], [0, 0, 1, 1], [], []>} : vector<1x128xf32>, vector<128x384xf32>, vector<1x384xf32> -> vector<1x384xf32>
    %59 = arith.index_cast %c0_i32_27 : i32 to index
    %c0_31 = arith.constant 0 : index
    %60 = vector.load %arg12[%59, %c0_31] : memref<8x384xf32, #tpu.memory_space<vmem>>, vector<1x384xf32>
    %61 = vector.extract_strided_slice %60 {offsets = [0, 0], sizes = [1, 128], strides = [1, 1]} : vector<1x384xf32> to vector<1x128xf32>
    %62 = vector.extract_strided_slice %58 {offsets = [0, 0], sizes = [1, 128], strides = [1, 1]} : vector<1x384xf32> to vector<1x128xf32>
    %63 = arith.addf %61, %62 : vector<1x128xf32>
    %64 = arith.negf %63 : vector<1x128xf32>
    %65 = math.exp %64 : vector<1x128xf32>
    %cst_32 = arith.constant 1.000000e+00 : f32
    %66 = vector.broadcast %cst_32 : f32 to vector<1x128xf32>
    %67 = arith.addf %66, %65 : vector<1x128xf32>
    %68 = arith.divf %66, %67 : vector<1x128xf32>
    %69 = vector.extract_strided_slice %60 {offsets = [0, 128], sizes = [1, 128], strides = [1, 1]} : vector<1x384xf32> to vector<1x128xf32>
    %70 = vector.extract_strided_slice %58 {offsets = [0, 128], sizes = [1, 128], strides = [1, 1]} : vector<1x384xf32> to vector<1x128xf32>
    %71 = arith.addf %69, %70 : vector<1x128xf32>
    %72 = arith.negf %71 : vector<1x128xf32>
    %73 = math.exp %72 : vector<1x128xf32>
    %cst_33 = arith.constant 1.000000e+00 : f32
    %74 = vector.broadcast %cst_33 : f32 to vector<1x128xf32>
    %75 = arith.addf %74, %73 : vector<1x128xf32>
    %76 = arith.divf %74, %75 : vector<1x128xf32>
    %77 = vector.extract_strided_slice %60 {offsets = [0, 256], sizes = [1, 128], strides = [1, 1]} : vector<1x384xf32> to vector<1x128xf32>
    %78 = vector.extract_strided_slice %58 {offsets = [0, 256], sizes = [1, 128], strides = [1, 1]} : vector<1x384xf32> to vector<1x128xf32>
    %79 = arith.addf %78, %55 : vector<1x128xf32>
    %80 = arith.mulf %68, %79 : vector<1x128xf32>
    %81 = arith.addf %77, %80 : vector<1x128xf32>
    %82 = math.tanh %81 : vector<1x128xf32>
    %cst_34 = arith.constant 1.000000e+00 : f32
    %83 = vector.broadcast %cst_34 : f32 to vector<1x128xf32>
    %84 = arith.subf %83, %76 : vector<1x128xf32>
    %85 = arith.mulf %84, %82 : vector<1x128xf32>
    %86 = arith.mulf %76, %56 : vector<1x128xf32>
    %87 = arith.addf %85, %86 : vector<1x128xf32>
    %88 = arith.index_cast %c0_i32_27 : i32 to index
    %c0_35 = arith.constant 0 : index
    %89 = vector.load %arg13[%88, %c0_35] : memref<8x128xf32, #tpu.memory_space<vmem>>, vector<1x128xf32>
    tpu.vector_store %arg13[%88, %c0_35], %87 {strides = array<i32>} : memref<8x128xf32, #tpu.memory_space<vmem>>, vector<1x128xf32>,
    %c1_i32_36 = arith.constant 1 : i32
    %c0_37 = arith.constant 0 : index
    %c0_38 = arith.constant 0 : index
    %90 = vector.load %arg4[%c0_37, %c0_38] : memref<128x384xf32, #tpu.memory_space<vmem>>, vector<128x384xf32>
    %cst_39 = arith.constant dense<0.000000e+00> : vector<1x384xf32>
    %91 = tpu.matmul %87, %90, %cst_39 {dimension_numbers = #tpu.dot_dimension_numbers<[1], [0], [0], [1], [0, 0, 1, 1], [], []>} : vector<1x128xf32>, vector<128x384xf32>, vector<1x384xf32> -> vector<1x384xf32>
    %92 = arith.index_cast %c1_i32_36 : i32 to index
    %c0_40 = arith.constant 0 : index
    %93 = vector.load %arg12[%92, %c0_40] : memref<8x384xf32, #tpu.memory_space<vmem>>, vector<1x384xf32>
    %94 = vector.extract_strided_slice %93 {offsets = [0, 0], sizes = [1, 128], strides = [1, 1]} : vector<1x384xf32> to vector<1x128xf32>
    %95 = vector.extract_strided_slice %91 {offsets = [0, 0], sizes = [1, 128], strides = [1, 1]} : vector<1x384xf32> to vector<1x128xf32>
    %96 = arith.addf %94, %95 : vector<1x128xf32>
    %97 = arith.negf %96 : vector<1x128xf32>
    %98 = math.exp %97 : vector<1x128xf32>
    %cst_41 = arith.constant 1.000000e+00 : f32
    %99 = vector.broadcast %cst_41 : f32 to vector<1x128xf32>
    %100 = arith.addf %99, %98 : vector<1x128xf32>
    %101 = arith.divf %99, %100 : vector<1x128xf32>
    %102 = vector.extract_strided_slice %93 {offsets = [0, 128], sizes = [1, 128], strides = [1, 1]} : vector<1x384xf32> to vector<1x128xf32>
    %103 = vector.extract_strided_slice %91 {offsets = [0, 128], sizes = [1, 128], strides = [1, 1]} : vector<1x384xf32> to vector<1x128xf32>
    %104 = arith.addf %102, %103 : vector<1x128xf32>
    %105 = arith.negf %104 : vector<1x128xf32>
    %106 = math.exp %105 : vector<1x128xf32>
    %cst_42 = arith.constant 1.000000e+00 : f32
    %107 = vector.broadcast %cst_42 : f32 to vector<1x128xf32>
    %108 = arith.addf %107, %106 : vector<1x128xf32>
    %109 = arith.divf %107, %108 : vector<1x128xf32>
    %110 = vector.extract_strided_slice %93 {offsets = [0, 256], sizes = [1, 128], strides = [1, 1]} : vector<1x384xf32> to vector<1x128xf32>
    %111 = vector.extract_strided_slice %91 {offsets = [0, 256], sizes = [1, 128], strides = [1, 1]} : vector<1x384xf32> to vector<1x128xf32>
    %112 = arith.addf %111, %55 : vector<1x128xf32>
    %113 = arith.mulf %101, %112 : vector<1x128xf32>
    %114 = arith.addf %110, %113 : vector<1x128xf32>
    %115 = math.tanh %114 : vector<1x128xf32>
    %cst_43 = arith.constant 1.000000e+00 : f32
    %116 = vector.broadcast %cst_43 : f32 to vector<1x128xf32>
    %117 = arith.subf %116, %109 : vector<1x128xf32>
    %118 = arith.mulf %117, %115 : vector<1x128xf32>
    %119 = arith.mulf %109, %87 : vector<1x128xf32>
    %120 = arith.addf %118, %119 : vector<1x128xf32>
    %121 = arith.index_cast %c1_i32_36 : i32 to index
    %c0_44 = arith.constant 0 : index
    %122 = vector.load %arg13[%121, %c0_44] : memref<8x128xf32, #tpu.memory_space<vmem>>, vector<1x128xf32>
    tpu.vector_store %arg13[%121, %c0_44], %120 {strides = array<i32>} : memref<8x128xf32, #tpu.memory_space<vmem>>, vector<1x128xf32>,
    %c2_i32_45 = arith.constant 2 : i32
    %c0_46 = arith.constant 0 : index
    %c0_47 = arith.constant 0 : index
    %123 = vector.load %arg4[%c0_46, %c0_47] : memref<128x384xf32, #tpu.memory_space<vmem>>, vector<128x384xf32>
    %cst_48 = arith.constant dense<0.000000e+00> : vector<1x384xf32>
    %124 = tpu.matmul %120, %123, %cst_48 {dimension_numbers = #tpu.dot_dimension_numbers<[1], [0], [0], [1], [0, 0, 1, 1], [], []>} : vector<1x128xf32>, vector<128x384xf32>, vector<1x384xf32> -> vector<1x384xf32>
    %125 = arith.index_cast %c2_i32_45 : i32 to index
    %c0_49 = arith.constant 0 : index
    %126 = vector.load %arg12[%125, %c0_49] : memref<8x384xf32, #tpu.memory_space<vmem>>, vector<1x384xf32>
    %127 = vector.extract_strided_slice %126 {offsets = [0, 0], sizes = [1, 128], strides = [1, 1]} : vector<1x384xf32> to vector<1x128xf32>
    %128 = vector.extract_strided_slice %124 {offsets = [0, 0], sizes = [1, 128], strides = [1, 1]} : vector<1x384xf32> to vector<1x128xf32>
    %129 = arith.addf %127, %128 : vector<1x128xf32>
    %130 = arith.negf %129 : vector<1x128xf32>
    %131 = math.exp %130 : vector<1x128xf32>
    %cst_50 = arith.constant 1.000000e+00 : f32
    %132 = vector.broadcast %cst_50 : f32 to vector<1x128xf32>
    %133 = arith.addf %132, %131 : vector<1x128xf32>
    %134 = arith.divf %132, %133 : vector<1x128xf32>
    %135 = vector.extract_strided_slice %126 {offsets = [0, 128], sizes = [1, 128], strides = [1, 1]} : vector<1x384xf32> to vector<1x128xf32>
    %136 = vector.extract_strided_slice %124 {offsets = [0, 128], sizes = [1, 128], strides = [1, 1]} : vector<1x384xf32> to vector<1x128xf32>
    %137 = arith.addf %135, %136 : vector<1x128xf32>
    %138 = arith.negf %137 : vector<1x128xf32>
    %139 = math.exp %138 : vector<1x128xf32>
    %cst_51 = arith.constant 1.000000e+00 : f32
    %140 = vector.broadcast %cst_51 : f32 to vector<1x128xf32>
    %141 = arith.addf %140, %139 : vector<1x128xf32>
    %142 = arith.divf %140, %141 : vector<1x128xf32>
    %143 = vector.extract_strided_slice %126 {offsets = [0, 256], sizes = [1, 128], strides = [1, 1]} : vector<1x384xf32> to vector<1x128xf32>
    %144 = vector.extract_strided_slice %124 {offsets = [0, 256], sizes = [1, 128], strides = [1, 1]} : vector<1x384xf32> to vector<1x128xf32>
    %145 = arith.addf %144, %55 : vector<1x128xf32>
    %146 = arith.mulf %134, %145 : vector<1x128xf32>
    %147 = arith.addf %143, %146 : vector<1x128xf32>
    %148 = math.tanh %147 : vector<1x128xf32>
    %cst_52 = arith.constant 1.000000e+00 : f32
    %149 = vector.broadcast %cst_52 : f32 to vector<1x128xf32>
    %150 = arith.subf %149, %142 : vector<1x128xf32>
    %151 = arith.mulf %150, %148 : vector<1x128xf32>
    %152 = arith.mulf %142, %120 : vector<1x128xf32>
    %153 = arith.addf %151, %152 : vector<1x128xf32>
    %154 = arith.index_cast %c2_i32_45 : i32 to index
    %c0_53 = arith.constant 0 : index
    %155 = vector.load %arg13[%154, %c0_53] : memref<8x128xf32, #tpu.memory_space<vmem>>, vector<1x128xf32>
    tpu.vector_store %arg13[%154, %c0_53], %153 {strides = array<i32>} : memref<8x128xf32, #tpu.memory_space<vmem>>, vector<1x128xf32>,
    %c3_i32_54 = arith.constant 3 : i32
    %c0_55 = arith.constant 0 : index
    %c0_56 = arith.constant 0 : index
    %156 = vector.load %arg4[%c0_55, %c0_56] : memref<128x384xf32, #tpu.memory_space<vmem>>, vector<128x384xf32>
    %cst_57 = arith.constant dense<0.000000e+00> : vector<1x384xf32>
    %157 = tpu.matmul %153, %156, %cst_57 {dimension_numbers = #tpu.dot_dimension_numbers<[1], [0], [0], [1], [0, 0, 1, 1], [], []>} : vector<1x128xf32>, vector<128x384xf32>, vector<1x384xf32> -> vector<1x384xf32>
    %158 = arith.index_cast %c3_i32_54 : i32 to index
    %c0_58 = arith.constant 0 : index
    %159 = vector.load %arg12[%158, %c0_58] : memref<8x384xf32, #tpu.memory_space<vmem>>, vector<1x384xf32>
    %160 = vector.extract_strided_slice %159 {offsets = [0, 0], sizes = [1, 128], strides = [1, 1]} : vector<1x384xf32> to vector<1x128xf32>
    %161 = vector.extract_strided_slice %157 {offsets = [0, 0], sizes = [1, 128], strides = [1, 1]} : vector<1x384xf32> to vector<1x128xf32>
    %162 = arith.addf %160, %161 : vector<1x128xf32>
    %163 = arith.negf %162 : vector<1x128xf32>
    %164 = math.exp %163 : vector<1x128xf32>
    %cst_59 = arith.constant 1.000000e+00 : f32
    %165 = vector.broadcast %cst_59 : f32 to vector<1x128xf32>
    %166 = arith.addf %165, %164 : vector<1x128xf32>
    %167 = arith.divf %165, %166 : vector<1x128xf32>
    %168 = vector.extract_strided_slice %159 {offsets = [0, 128], sizes = [1, 128], strides = [1, 1]} : vector<1x384xf32> to vector<1x128xf32>
    %169 = vector.extract_strided_slice %157 {offsets = [0, 128], sizes = [1, 128], strides = [1, 1]} : vector<1x384xf32> to vector<1x128xf32>
    %170 = arith.addf %168, %169 : vector<1x128xf32>
    %171 = arith.negf %170 : vector<1x128xf32>
    %172 = math.exp %171 : vector<1x128xf32>
    %cst_60 = arith.constant 1.000000e+00 : f32
    %173 = vector.broadcast %cst_60 : f32 to vector<1x128xf32>
    %174 = arith.addf %173, %172 : vector<1x128xf32>
    %175 = arith.divf %173, %174 : vector<1x128xf32>
    %176 = vector.extract_strided_slice %159 {offsets = [0, 256], sizes = [1, 128], strides = [1, 1]} : vector<1x384xf32> to vector<1x128xf32>
    %177 = vector.extract_strided_slice %157 {offsets = [0, 256], sizes = [1, 128], strides = [1, 1]} : vector<1x384xf32> to vector<1x128xf32>
    %178 = arith.addf %177, %55 : vector<1x128xf32>
    %179 = arith.mulf %167, %178 : vector<1x128xf32>
    %180 = arith.addf %176, %179 : vector<1x128xf32>
    %181 = math.tanh %180 : vector<1x128xf32>
    %cst_61 = arith.constant 1.000000e+00 : f32
    %182 = vector.broadcast %cst_61 : f32 to vector<1x128xf32>
    %183 = arith.subf %182, %175 : vector<1x128xf32>
    %184 = arith.mulf %183, %181 : vector<1x128xf32>
    %185 = arith.mulf %175, %153 : vector<1x128xf32>
    %186 = arith.addf %184, %185 : vector<1x128xf32>
    %187 = arith.index_cast %c3_i32_54 : i32 to index
    %c0_62 = arith.constant 0 : index
    %188 = vector.load %arg13[%187, %c0_62] : memref<8x128xf32, #tpu.memory_space<vmem>>, vector<1x128xf32>
    tpu.vector_store %arg13[%187, %c0_62], %186 {strides = array<i32>} : memref<8x128xf32, #tpu.memory_space<vmem>>, vector<1x128xf32>,
    %c4_i32_63 = arith.constant 4 : i32
    %c0_64 = arith.constant 0 : index
    %c0_65 = arith.constant 0 : index
    %189 = vector.load %arg4[%c0_64, %c0_65] : memref<128x384xf32, #tpu.memory_space<vmem>>, vector<128x384xf32>
    %cst_66 = arith.constant dense<0.000000e+00> : vector<1x384xf32>
    %190 = tpu.matmul %186, %189, %cst_66 {dimension_numbers = #tpu.dot_dimension_numbers<[1], [0], [0], [1], [0, 0, 1, 1], [], []>} : vector<1x128xf32>, vector<128x384xf32>, vector<1x384xf32> -> vector<1x384xf32>
    %191 = arith.index_cast %c4_i32_63 : i32 to index
    %c0_67 = arith.constant 0 : index
    %192 = vector.load %arg12[%191, %c0_67] : memref<8x384xf32, #tpu.memory_space<vmem>>, vector<1x384xf32>
    %193 = vector.extract_strided_slice %192 {offsets = [0, 0], sizes = [1, 128], strides = [1, 1]} : vector<1x384xf32> to vector<1x128xf32>
    %194 = vector.extract_strided_slice %190 {offsets = [0, 0], sizes = [1, 128], strides = [1, 1]} : vector<1x384xf32> to vector<1x128xf32>
    %195 = arith.addf %193, %194 : vector<1x128xf32>
    %196 = arith.negf %195 : vector<1x128xf32>
    %197 = math.exp %196 : vector<1x128xf32>
    %cst_68 = arith.constant 1.000000e+00 : f32
    %198 = vector.broadcast %cst_68 : f32 to vector<1x128xf32>
    %199 = arith.addf %198, %197 : vector<1x128xf32>
    %200 = arith.divf %198, %199 : vector<1x128xf32>
    %201 = vector.extract_strided_slice %192 {offsets = [0, 128], sizes = [1, 128], strides = [1, 1]} : vector<1x384xf32> to vector<1x128xf32>
    %202 = vector.extract_strided_slice %190 {offsets = [0, 128], sizes = [1, 128], strides = [1, 1]} : vector<1x384xf32> to vector<1x128xf32>
    %203 = arith.addf %201, %202 : vector<1x128xf32>
    %204 = arith.negf %203 : vector<1x128xf32>
    %205 = math.exp %204 : vector<1x128xf32>
    %cst_69 = arith.constant 1.000000e+00 : f32
    %206 = vector.broadcast %cst_69 : f32 to vector<1x128xf32>
    %207 = arith.addf %206, %205 : vector<1x128xf32>
    %208 = arith.divf %206, %207 : vector<1x128xf32>
    %209 = vector.extract_strided_slice %192 {offsets = [0, 256], sizes = [1, 128], strides = [1, 1]} : vector<1x384xf32> to vector<1x128xf32>
    %210 = vector.extract_strided_slice %190 {offsets = [0, 256], sizes = [1, 128], strides = [1, 1]} : vector<1x384xf32> to vector<1x128xf32>
    %211 = arith.addf %210, %55 : vector<1x128xf32>
    %212 = arith.mulf %200, %211 : vector<1x128xf32>
    %213 = arith.addf %209, %212 : vector<1x128xf32>
    %214 = math.tanh %213 : vector<1x128xf32>
    %cst_70 = arith.constant 1.000000e+00 : f32
    %215 = vector.broadcast %cst_70 : f32 to vector<1x128xf32>
    %216 = arith.subf %215, %208 : vector<1x128xf32>
    %217 = arith.mulf %216, %214 : vector<1x128xf32>
    %218 = arith.mulf %208, %186 : vector<1x128xf32>
    %219 = arith.addf %217, %218 : vector<1x128xf32>
    %220 = arith.index_cast %c4_i32_63 : i32 to index
    %c0_71 = arith.constant 0 : index
    %221 = vector.load %arg13[%220, %c0_71] : memref<8x128xf32, #tpu.memory_space<vmem>>, vector<1x128xf32>
    tpu.vector_store %arg13[%220, %c0_71], %219 {strides = array<i32>} : memref<8x128xf32, #tpu.memory_space<vmem>>, vector<1x128xf32>,
    %c5_i32_72 = arith.constant 5 : i32
    %c0_73 = arith.constant 0 : index
    %c0_74 = arith.constant 0 : index
    %222 = vector.load %arg4[%c0_73, %c0_74] : memref<128x384xf32, #tpu.memory_space<vmem>>, vector<128x384xf32>
    %cst_75 = arith.constant dense<0.000000e+00> : vector<1x384xf32>
    %223 = tpu.matmul %219, %222, %cst_75 {dimension_numbers = #tpu.dot_dimension_numbers<[1], [0], [0], [1], [0, 0, 1, 1], [], []>} : vector<1x128xf32>, vector<128x384xf32>, vector<1x384xf32> -> vector<1x384xf32>
    %224 = arith.index_cast %c5_i32_72 : i32 to index
    %c0_76 = arith.constant 0 : index
    %225 = vector.load %arg12[%224, %c0_76] : memref<8x384xf32, #tpu.memory_space<vmem>>, vector<1x384xf32>
    %226 = vector.extract_strided_slice %225 {offsets = [0, 0], sizes = [1, 128], strides = [1, 1]} : vector<1x384xf32> to vector<1x128xf32>
    %227 = vector.extract_strided_slice %223 {offsets = [0, 0], sizes = [1, 128], strides = [1, 1]} : vector<1x384xf32> to vector<1x128xf32>
    %228 = arith.addf %226, %227 : vector<1x128xf32>
    %229 = arith.negf %228 : vector<1x128xf32>
    %230 = math.exp %229 : vector<1x128xf32>
    %cst_77 = arith.constant 1.000000e+00 : f32
    %231 = vector.broadcast %cst_77 : f32 to vector<1x128xf32>
    %232 = arith.addf %231, %230 : vector<1x128xf32>
    %233 = arith.divf %231, %232 : vector<1x128xf32>
    %234 = vector.extract_strided_slice %225 {offsets = [0, 128], sizes = [1, 128], strides = [1, 1]} : vector<1x384xf32> to vector<1x128xf32>
    %235 = vector.extract_strided_slice %223 {offsets = [0, 128], sizes = [1, 128], strides = [1, 1]} : vector<1x384xf32> to vector<1x128xf32>
    %236 = arith.addf %234, %235 : vector<1x128xf32>
    %237 = arith.negf %236 : vector<1x128xf32>
    %238 = math.exp %237 : vector<1x128xf32>
    %cst_78 = arith.constant 1.000000e+00 : f32
    %239 = vector.broadcast %cst_78 : f32 to vector<1x128xf32>
    %240 = arith.addf %239, %238 : vector<1x128xf32>
    %241 = arith.divf %239, %240 : vector<1x128xf32>
    %242 = vector.extract_strided_slice %225 {offsets = [0, 256], sizes = [1, 128], strides = [1, 1]} : vector<1x384xf32> to vector<1x128xf32>
    %243 = vector.extract_strided_slice %223 {offsets = [0, 256], sizes = [1, 128], strides = [1, 1]} : vector<1x384xf32> to vector<1x128xf32>
    %244 = arith.addf %243, %55 : vector<1x128xf32>
    %245 = arith.mulf %233, %244 : vector<1x128xf32>
    %246 = arith.addf %242, %245 : vector<1x128xf32>
    %247 = math.tanh %246 : vector<1x128xf32>
    %cst_79 = arith.constant 1.000000e+00 : f32
    %248 = vector.broadcast %cst_79 : f32 to vector<1x128xf32>
    %249 = arith.subf %248, %241 : vector<1x128xf32>
    %250 = arith.mulf %249, %247 : vector<1x128xf32>
    %251 = arith.mulf %241, %219 : vector<1x128xf32>
    %252 = arith.addf %250, %251 : vector<1x128xf32>
    %253 = arith.index_cast %c5_i32_72 : i32 to index
    %c0_80 = arith.constant 0 : index
    %254 = vector.load %arg13[%253, %c0_80] : memref<8x128xf32, #tpu.memory_space<vmem>>, vector<1x128xf32>
    tpu.vector_store %arg13[%253, %c0_80], %252 {strides = array<i32>} : memref<8x128xf32, #tpu.memory_space<vmem>>, vector<1x128xf32>,
    %c6_i32_81 = arith.constant 6 : i32
    %c0_82 = arith.constant 0 : index
    %c0_83 = arith.constant 0 : index
    %255 = vector.load %arg4[%c0_82, %c0_83] : memref<128x384xf32, #tpu.memory_space<vmem>>, vector<128x384xf32>
    %cst_84 = arith.constant dense<0.000000e+00> : vector<1x384xf32>
    %256 = tpu.matmul %252, %255, %cst_84 {dimension_numbers = #tpu.dot_dimension_numbers<[1], [0], [0], [1], [0, 0, 1, 1], [], []>} : vector<1x128xf32>, vector<128x384xf32>, vector<1x384xf32> -> vector<1x384xf32>
    %257 = arith.index_cast %c6_i32_81 : i32 to index
    %c0_85 = arith.constant 0 : index
    %258 = vector.load %arg12[%257, %c0_85] : memref<8x384xf32, #tpu.memory_space<vmem>>, vector<1x384xf32>
    %259 = vector.extract_strided_slice %258 {offsets = [0, 0], sizes = [1, 128], strides = [1, 1]} : vector<1x384xf32> to vector<1x128xf32>
    %260 = vector.extract_strided_slice %256 {offsets = [0, 0], sizes = [1, 128], strides = [1, 1]} : vector<1x384xf32> to vector<1x128xf32>
    %261 = arith.addf %259, %260 : vector<1x128xf32>
    %262 = arith.negf %261 : vector<1x128xf32>
    %263 = math.exp %262 : vector<1x128xf32>
    %cst_86 = arith.constant 1.000000e+00 : f32
    %264 = vector.broadcast %cst_86 : f32 to vector<1x128xf32>
    %265 = arith.addf %264, %263 : vector<1x128xf32>
    %266 = arith.divf %264, %265 : vector<1x128xf32>
    %267 = vector.extract_strided_slice %258 {offsets = [0, 128], sizes = [1, 128], strides = [1, 1]} : vector<1x384xf32> to vector<1x128xf32>
    %268 = vector.extract_strided_slice %256 {offsets = [0, 128], sizes = [1, 128], strides = [1, 1]} : vector<1x384xf32> to vector<1x128xf32>
    %269 = arith.addf %267, %268 : vector<1x128xf32>
    %270 = arith.negf %269 : vector<1x128xf32>
    %271 = math.exp %270 : vector<1x128xf32>
    %cst_87 = arith.constant 1.000000e+00 : f32
    %272 = vector.broadcast %cst_87 : f32 to vector<1x128xf32>
    %273 = arith.addf %272, %271 : vector<1x128xf32>
    %274 = arith.divf %272, %273 : vector<1x128xf32>
    %275 = vector.extract_strided_slice %258 {offsets = [0, 256], sizes = [1, 128], strides = [1, 1]} : vector<1x384xf32> to vector<1x128xf32>
    %276 = vector.extract_strided_slice %256 {offsets = [0, 256], sizes = [1, 128], strides = [1, 1]} : vector<1x384xf32> to vector<1x128xf32>
    %277 = arith.addf %276, %55 : vector<1x128xf32>
    %278 = arith.mulf %266, %277 : vector<1x128xf32>
    %279 = arith.addf %275, %278 : vector<1x128xf32>
    %280 = math.tanh %279 : vector<1x128xf32>
    %cst_88 = arith.constant 1.000000e+00 : f32
    %281 = vector.broadcast %cst_88 : f32 to vector<1x128xf32>
    %282 = arith.subf %281, %274 : vector<1x128xf32>
    %283 = arith.mulf %282, %280 : vector<1x128xf32>
    %284 = arith.mulf %274, %252 : vector<1x128xf32>
    %285 = arith.addf %283, %284 : vector<1x128xf32>
    %286 = arith.index_cast %c6_i32_81 : i32 to index
    %c0_89 = arith.constant 0 : index
    %287 = vector.load %arg13[%286, %c0_89] : memref<8x128xf32, #tpu.memory_space<vmem>>, vector<1x128xf32>
    tpu.vector_store %arg13[%286, %c0_89], %285 {strides = array<i32>} : memref<8x128xf32, #tpu.memory_space<vmem>>, vector<1x128xf32>,
    %c7_i32_90 = arith.constant 7 : i32
    %c0_91 = arith.constant 0 : index
    %c0_92 = arith.constant 0 : index
    %288 = vector.load %arg4[%c0_91, %c0_92] : memref<128x384xf32, #tpu.memory_space<vmem>>, vector<128x384xf32>
    %cst_93 = arith.constant dense<0.000000e+00> : vector<1x384xf32>
    %289 = tpu.matmul %285, %288, %cst_93 {dimension_numbers = #tpu.dot_dimension_numbers<[1], [0], [0], [1], [0, 0, 1, 1], [], []>} : vector<1x128xf32>, vector<128x384xf32>, vector<1x384xf32> -> vector<1x384xf32>
    %290 = arith.index_cast %c7_i32_90 : i32 to index
    %c0_94 = arith.constant 0 : index
    %291 = vector.load %arg12[%290, %c0_94] : memref<8x384xf32, #tpu.memory_space<vmem>>, vector<1x384xf32>
    %292 = vector.extract_strided_slice %291 {offsets = [0, 0], sizes = [1, 128], strides = [1, 1]} : vector<1x384xf32> to vector<1x128xf32>
    %293 = vector.extract_strided_slice %289 {offsets = [0, 0], sizes = [1, 128], strides = [1, 1]} : vector<1x384xf32> to vector<1x128xf32>
    %294 = arith.addf %292, %293 : vector<1x128xf32>
    %295 = arith.negf %294 : vector<1x128xf32>
    %296 = math.exp %295 : vector<1x128xf32>
    %cst_95 = arith.constant 1.000000e+00 : f32
    %297 = vector.broadcast %cst_95 : f32 to vector<1x128xf32>
    %298 = arith.addf %297, %296 : vector<1x128xf32>
    %299 = arith.divf %297, %298 : vector<1x128xf32>
    %300 = vector.extract_strided_slice %291 {offsets = [0, 128], sizes = [1, 128], strides = [1, 1]} : vector<1x384xf32> to vector<1x128xf32>
    %301 = vector.extract_strided_slice %289 {offsets = [0, 128], sizes = [1, 128], strides = [1, 1]} : vector<1x384xf32> to vector<1x128xf32>
    %302 = arith.addf %300, %301 : vector<1x128xf32>
    %303 = arith.negf %302 : vector<1x128xf32>
    %304 = math.exp %303 : vector<1x128xf32>
    %cst_96 = arith.constant 1.000000e+00 : f32
    %305 = vector.broadcast %cst_96 : f32 to vector<1x128xf32>
    %306 = arith.addf %305, %304 : vector<1x128xf32>
    %307 = arith.divf %305, %306 : vector<1x128xf32>
    %308 = vector.extract_strided_slice %291 {offsets = [0, 256], sizes = [1, 128], strides = [1, 1]} : vector<1x384xf32> to vector<1x128xf32>
    %309 = vector.extract_strided_slice %289 {offsets = [0, 256], sizes = [1, 128], strides = [1, 1]} : vector<1x384xf32> to vector<1x128xf32>
    %310 = arith.addf %309, %55 : vector<1x128xf32>
    %311 = arith.mulf %299, %310 : vector<1x128xf32>
    %312 = arith.addf %308, %311 : vector<1x128xf32>
    %313 = math.tanh %312 : vector<1x128xf32>
    %cst_97 = arith.constant 1.000000e+00 : f32
    %314 = vector.broadcast %cst_97 : f32 to vector<1x128xf32>
    %315 = arith.subf %314, %307 : vector<1x128xf32>
    %316 = arith.mulf %315, %313 : vector<1x128xf32>
    %317 = arith.mulf %307, %285 : vector<1x128xf32>
    %318 = arith.addf %316, %317 : vector<1x128xf32>
    %319 = arith.index_cast %c7_i32_90 : i32 to index
    %c0_98 = arith.constant 0 : index
    %320 = vector.load %arg13[%319, %c0_98] : memref<8x128xf32, #tpu.memory_space<vmem>>, vector<1x128xf32>
    tpu.vector_store %arg13[%319, %c0_98], %318 {strides = array<i32>} : memref<8x128xf32, #tpu.memory_space<vmem>>, vector<1x128xf32>,
    %c8_i32_99 = arith.constant 8 : i32
    %c0_100 = arith.constant 0 : index
    %c0_101 = arith.constant 0 : index
    %321 = vector.load %arg10[%c0_100, %c0_101] : memref<1x128xf32, #tpu.memory_space<vmem>>, vector<1x128xf32>
    tpu.vector_store %arg10[%c0_100, %c0_101], %318 {strides = array<i32>} : memref<1x128xf32, #tpu.memory_space<vmem>>, vector<1x128xf32>,
    %c0_102 = arith.constant 0 : index
    %c0_103 = arith.constant 0 : index
    %322 = vector.load %arg13[%c0_102, %c0_103] : memref<8x128xf32, #tpu.memory_space<vmem>>, vector<8x128xf32>
    %c0_104 = arith.constant 0 : index
    %c0_105 = arith.constant 0 : index
    %323 = vector.load %arg7[%c0_104, %c0_105] : memref<128x128xf32, #tpu.memory_space<vmem>>, vector<128x128xf32>
    %cst_106 = arith.constant dense<0.000000e+00> : vector<8x128xf32>
    %324 = tpu.matmul %322, %323, %cst_106 {dimension_numbers = #tpu.dot_dimension_numbers<[1], [0], [0], [1], [0, 0, 1, 1], [], []>} : vector<8x128xf32>, vector<128x128xf32>, vector<8x128xf32> -> vector<8x128xf32>
    %c0_107 = arith.constant 0 : index
    %c0_108 = arith.constant 0 : index
    %325 = vector.load %arg8[%c0_107, %c0_108] : memref<1x128xf32, #tpu.memory_space<vmem>>, vector<1x128xf32>
    %326 = vector.broadcast %325 : vector<1x128xf32> to vector<8x128xf32>
    %327 = arith.addf %324, %326 : vector<8x128xf32>
    %cst_109 = arith.constant dense<0xFF800000> : vector<8xf32>
    %328 = vector.multi_reduction <maximumf>, %327, %cst_109 [1] : vector<8x128xf32> to vector<8xf32>
    %329 = vector.shape_cast %328 : vector<8xf32> to vector<8x1xf32>
    %330 = vector.broadcast %329 : vector<8x1xf32> to vector<8x128xf32>
    %331 = arith.subf %327, %330 : vector<8x128xf32>
    %332 = math.exp %331 : vector<8x128xf32>
    %cst_110 = arith.constant dense<0.000000e+00> : vector<8xf32>
    %333 = vector.multi_reduction <add>, %332, %cst_110 [1] : vector<8x128xf32> to vector<8xf32>
    %334 = vector.shape_cast %333 : vector<8xf32> to vector<8x1xf32>
    %335 = math.log %334 : vector<8x1xf32>
    %336 = vector.broadcast %335 : vector<8x1xf32> to vector<8x128xf32>
    %337 = arith.subf %331, %336 : vector<8x128xf32>
    %c0_111 = arith.constant 0 : index
    %c0_112 = arith.constant 0 : index
    %338 = vector.load %arg9[%c0_111, %c0_112] : memref<8x128xf32, #tpu.memory_space<vmem>>, vector<8x128xf32>
    tpu.vector_store %arg9[%c0_111, %c0_112], %337 {strides = array<i32>} : memref<8x128xf32, #tpu.memory_space<vmem>>, vector<8x128xf32>,
    return
  }
}

</mosaic_0001>

<bundles_post_ra>
// kernel: gru_decode.1
= control target key start
LH: loop header
LB: loop body
LE: loop exit
PB: predicated region body
PF: predicated region fallthrough
CT: control target
= control target key end

     0   :  { %16 = vsyncpa [#allocation8], 0  ;;  %s2749_s0 = inlined_call_operand.hbm [shape: s32[8], index: 0, kind: input, shape index: {}]   ;;  %s2750_s1 = inlined_call_operand.hbm [shape: f32[64,128], index: 1, kind: input, shape index: {}]   ;;  %s2751_s2 = inlined_call_operand.vmem [shape: f32[1,128], index: 2, kind: input, shape index: {}]   ;;  %s2752_s3 = inlined_call_operand.hbm [shape: f32[128,384], index: 3, kind: input, shape index: {}]   ;;  %s2753_s4 = inlined_call_operand.hbm [shape: f32[128,384], index: 4, kind: input, shape index: {}]   ;;  %s2754_s5 = inlined_call_operand.vmem [shape: f32[1,384], index: 5, kind: input, shape index: {}]   ;;  %s2755_s6 = inlined_call_operand.vmem [shape: f32[1,128], index: 6, kind: input, shape index: {}]   ;;  %s2756_s7 = inlined_call_operand.hbm [shape: f32[128,128], index: 7, kind: input, shape index: {}]   ;;  %s2757_s8 = inlined_call_operand.vmem [shape: f32[1,128], index: 8, kind: input, shape index: {}]   ;;  %s2758_s9 = inlined_call_operand.hbm [shape: f32[8,128], index: 9, kind: output, shape index: {0}]   ;;  %s2759_s10 = inlined_call_operand.hbm [shape: f32[1,128], index: 10, kind: output, shape index: {1}]  }
   0x1   :  { %17 = vsyncpa [#allocation6], 0 }
   0x2   :  { %18 = vsyncpa [#allocation11], 0 }
   0x3   :  { %19 = vsyncpa [#allocation14], 0 }
   0x4   :  { %20 = vsyncpa [#allocation7], 0  ;;  %s50_s15 = sshll.u32 %s2752_s3, 4  ;;  %s51_s15 = int_to_ptr.hbm [resolvable:$true] %s50_s15 }
   0x5   :  { %21 = vsyncpa [#allocation17], 0  ;;  %s1962_s16 = smov [#allocation10]   ;;  %s27_s20 = sshll.u32 %s2749_s0, 4  ;;  %s28_s20 = int_to_ptr.hbm [resolvable:$true] %s27_s20 }
   0x6   :  { %s52_s17 = sshll.u32 %s1962_s16, 4  ;;  %s1963_s21 = smov 384   ;;  %s53_s17 = int_to_ptr.vmem [resolvable:$true] %s52_s17 }
   0x7   :  { %s1964_s22 = smov 24   ;;  %s1965_s23 = smov [#allocation5]  }
   0x8   :  { %58 = dma.hbm_to_vmem [thread:$0]  %s51_s15, 6144, %s53_s17, [#allocation11], %s1963_s21, %s1963_s21, %s1964_s22  }
   0x9   :  { %30 = dma.hbm_to_smem %s28_s20, 16, %s1965_s23, [#allocation8]  }
   0xa   :  { %s35_s26 = sshll.u32 %s2750_s1, 4  ;;  %s1966_s3 = smov [#allocation9]   ;;  %s36_s26 = int_to_ptr.hbm [resolvable:$true] %s35_s26 }
   0xb   :  { %s37_s27 = sshll.u32 %s1966_s3, 4  ;;  %s63_s30 = sshll.u32 %s2753_s4, 4  ;;  %s38_s27 = int_to_ptr.vmem [resolvable:$true] %s37_s27  ;;  %s64_s30 = int_to_ptr.hbm [resolvable:$true] %s63_s30 }
   0xc   :  { %s1967_s11 = smov 128   ;;  %s1968_s0 = smov 8  }
   0xd   :  { %43 = dma.hbm_to_vmem [thread:$0]  %s36_s26, 1024, %s38_s27, [#allocation6], %s1967_s11, %s1967_s11, %s1968_s0  }
   0xe   :  { %s1969_s12 = smov [#allocation12]   ;;  %s80_s16 = sshll.u32 %s2756_s7, 4  ;;  %s81_s16 = int_to_ptr.hbm [resolvable:$true] %s80_s16 }
   0xf   :  { %s65_s13 = sshll.u32 %s1969_s12, 4  ;;  %s1970_s1 = smov [#allocation13]   ;;  %s66_s13 = int_to_ptr.vmem [resolvable:$true] %s65_s13 }
  0x10   :  { %71 = dma.hbm_to_vmem [thread:$0]  %s64_s30, 6144, %s66_s13, [#allocation11], %s1963_s21, %s1963_s21, %s1964_s22  }
  0x11   :  { %s82_s17 = sshll.u32 %s1970_s1, 4  ;;  %s83_s17 = int_to_ptr.vmem [resolvable:$true] %s82_s17 }
  0x12   :  { %88 = dma.hbm_to_vmem [thread:$0]  %s81_s16, 2048, %s83_s17, [#allocation14], %s1967_s11, %s1967_s11, %s1968_s0  }
  0x13   :  { %1950 = dma.done.wait [#allocation8], 16  }
  0x14   :  { %1951 = vsyncadd [#allocation8], 4294967280 }
  0x15   :  { %1952 = dma.done.wait [#allocation6], 1024  }
  0x16   :  { %1953 = vsyncadd [#allocation6], 4294966272 }
  0x17   :  { %1954 = dma.done.wait [#allocation11], 12288  }
  0x18   :  { %1955 = vsyncadd [#allocation11], 4294955008 }
  0x19   :  { %1956 = dma.done.wait [#allocation14], 2048  }
  0x1a   :  { %1957 = vsyncadd [#allocation14], 4294965248 }
  0x1b   :  { %111 = sfence }
  0x1c   :  { %v190_v0 = vld [vmem:[#allocation10 + $0x168] sm:$0xff]  ;;  %v192_v1 = vld [vmem:[#allocation10 + $0x178] sm:$0xff]  ;;  %v187_v2 = vld [vmem:[#allocation10 + $0x150] sm:$0xff]  ;;  %s2043_s4 = sld [smem:[#allocation5]]  ;;  %s1971_s1 = smov [#allocation16]  }
  0x1d   :  { %201 = vmatpush.msra.mxu0 %v190_v0  ;;  %241 = vmatpush.msra.mxu2 %v192_v1  ;;  %v189_v3 = vld [vmem:[#allocation10 + $0x160] sm:$0xff]  ;;  %v184_v4 = vld [vmem:[#allocation10 + $0x138] sm:$0xff]  ;;  %v186_v5 = vld [vmem:[#allocation10 + $0x148] sm:$0xff]  ;;  %s2045_s7 = sld [smem:[#allocation5 + $0x1]]  ;;  %s1646_s17 = sshll.u32 %s1971_s1, 4  ;;  %s1647_s17 = int_to_ptr.vmem [resolvable:$true] %s1646_s17 }
  0x1e   :  { %v191_v6 = vld [vmem:[#allocation10 + $0x170] sm:$0xff]  ;;  %v188_v7 = vld [vmem:[#allocation10 + $0x158] sm:$0xff]  ;;  %v181_v8 = vld [vmem:[#allocation10 + $0x120] sm:$0xff]  ;;  %s2049_s18 = sld [smem:[#allocation5 + $0x2]] }
  0x1f   :  { %202 = vmatpush.msra.mxu0 %v187_v2  ;;  %242 = vmatpush.msra.mxu2 %v189_v3  ;;  %v183_v9 = vld [vmem:[#allocation10 + $0x130] sm:$0xff]  ;;  %v185_v10 = vld [vmem:[#allocation10 + $0x140] sm:$0xff]  ;;  %v2047_v11 = vld [vmem:[#allocation12 + $0x168] sm:$0xff]  ;;  %s2054_s19 = sld [smem:[#allocation5 + $0x3]] }
  0x20   :  { %221 = vmatpush.msra.mxu1 %v191_v6  ;;  %v178_v12 = vld [vmem:[#allocation10 + $0x108] sm:$0xff]  ;;  %v180_v13 = vld [vmem:[#allocation10 + $0x118] sm:$0xff]  ;;  %314 = vmatpush.msra.mxu3 %v2047_v11  ;;  %v2052_v14 = vld [vmem:[#allocation12 + $0x150] sm:$0xff]  ;;  %s2058_s20 = sld [smem:[#allocation5 + $0x4]] }
  0x21   :  { %203 = vmatpush.msra.mxu0 %v184_v4  ;;  %243 = vmatpush.msra.mxu2 %v186_v5  ;;  %v182_v15 = vld [vmem:[#allocation10 + $0x128] sm:$0xff]  ;;  %v2056_v16 = vld [vmem:[#allocation12 + $0x138] sm:$0xff]  ;;  %v175_v17 = vld [vmem:[#allocation10 + $0xf0] sm:$0xff]  ;;  %s2061_s21 = sld [smem:[#allocation5 + $0x5]] }
  0x22   :  { %222 = vmatpush.msra.mxu1 %v188_v7  ;;  %v177_v18 = vld [vmem:[#allocation10 + $0x100] sm:$0xff]  ;;  %315 = vmatpush.msra.mxu3 %v2052_v14  ;;  %v179_v19 = vld [vmem:[#allocation10 + $0x110] sm:$0xff]  ;;  %s2065_s22 = sld [smem:[#allocation5 + $0x6]]  ;;  %v172_v21 = vld [vmem:[#allocation10 + $0xd8] sm:$0xff]  ;;  %s113_s24 = scalar_lea.vmem [#allocation9], %s2043_s4 }
  0x23   :  { %204 = vmatpush.msra.mxu0 %v181_v8  ;;  %244 = vmatpush.msra.mxu2 %v183_v9  ;;  %v2063_v20 = vld [vmem:[#allocation12 + $0x120] sm:$0xff]  ;;  %v174_v22 = vld [vmem:[#allocation10 + $0xe8] sm:$0xff]  ;;  %s2068_s23 = sld [smem:[#allocation5 + $0x7]]  ;;  %v176_v23 = vld [vmem:[#allocation10 + $0xf8] sm:$0xff]  ;;  %s117_s25 = scalar_lea.vmem [#allocation9], %s2045_s7 }
  0x24   :  { %223 = vmatpush.msra.mxu1 %v185_v10  ;;  %316 = vmatpush.msra.mxu3 %v2056_v16  ;;  %v2070_v24 = vld [vmem:[#allocation12 + $0x108] sm:$0xff]  ;;  %v169_v25 = vld [vmem:[#allocation10 + $0xc0] sm:$0xff]  ;;  %v171_v26 = vld [vmem:[#allocation10 + $0xd0] sm:$0xff]  ;;  %s121_s26 = scalar_lea.vmem [#allocation9], %s2049_s18  ;;  %s1648_s18 = sshll.u32 %s2759_s10, 4  ;;  %s1649_s18 = int_to_ptr.hbm [resolvable:$true] %s1648_s18 }
  0x25   :  { %205 = vmatpush.msra.mxu0 %v178_v12  ;;  %245 = vmatpush.msra.mxu2 %v180_v13  ;;  %v173_v27 = vld [vmem:[#allocation10 + $0xe0] sm:$0xff]  ;;  %v2073_v28 = vld [vmem:[#allocation12 + $0xf0] sm:$0xff]  ;;  %v166_v29 = vld [vmem:[#allocation10 + $0xa8] sm:$0xff]  ;;  %s125_s3 = scalar_lea.vmem [#allocation9], %s2054_s19 }
  0x26   :  { %224 = vmatpush.msra.mxu1 %v182_v15  ;;  %317 = vmatpush.msra.mxu3 %v2063_v20  ;;  %v168_v30 = vld [vmem:[#allocation10 + $0xb8] sm:$0xff]  ;;  %v170_v31 = vld [vmem:[#allocation10 + $0xc8] sm:$0xff]  ;;  %v163_v33 = vld [vmem:[#allocation10 + $0x90] sm:$0xff]  ;;  %s129_s27 = scalar_lea.vmem [#allocation9], %s2058_s20 }
  0x27   :  { %206 = vmatpush.msra.mxu0 %v175_v17  ;;  %246 = vmatpush.msra.mxu2 %v177_v18  ;;  %v2076_v32 = vld [vmem:[#allocation12 + $0xd8] sm:$0xff]  ;;  %v165_v34 = vld [vmem:[#allocation10 + $0xa0] sm:$0xff]  ;;  %v162_v36 = vld [vmem:[#allocation10 + $0x88] sm:$0xff]  ;;  %s133_s28 = scalar_lea.vmem [#allocation9], %s2061_s21 }
  0x28   :  { %225 = vmatpush.msra.mxu1 %v179_v19  ;;  %318 = vmatpush.msra.mxu3 %v2070_v24  ;;  %v160_v35 = vld [vmem:[#allocation10 + $0x78] sm:$0xff]  ;;  %v167_v37 = vld [vmem:[#allocation10 + $0xb0] sm:$0xff]  ;;  %v2079_v38 = vld [vmem:[#allocation12 + $0xc0] sm:$0xff]  ;;  %s137_s29 = scalar_lea.vmem [#allocation9], %s2065_s22  ;;  %s1637_s22 = sshll.u32 %s2758_s9, 4  ;;  %s1638_s22 = int_to_ptr.hbm [resolvable:$true] %s1637_s22 }
  0x29   :  { %207 = vmatpush.msra.mxu0 %v172_v21  ;;  %247 = vmatpush.msra.mxu2 %v174_v22  ;;  %v157_v39 = vld [vmem:[#allocation10 + $0x60] sm:$0xff]  ;;  %v159_v40 = vld [vmem:[#allocation10 + $0x70] sm:$0xff]  ;;  %v164_v41 = vld [vmem:[#allocation10 + $0x98] sm:$0xff]  ;;  %s141_s30 = scalar_lea.vmem [#allocation9], %s2068_s23 }
  0x2a   :  { %226 = vmatpush.msra.mxu1 %v176_v23  ;;  %319 = vmatpush.msra.mxu3 %v2073_v28  ;;  %v2082_v42 = vld [vmem:[#allocation12 + $0xa8] sm:$0xff]  ;;  %v114_v43 = vld [vmem:[%s113_s24] sm:$0x1]  ;;  %v161_v48 = vld [vmem:[#allocation10 + $0x80] sm:$0xff] }
  0x2b   :  { %208 = vmatpush.msra.mxu0 %v169_v25  ;;  %248 = vmatpush.msra.mxu2 %v171_v26  ;;  %115 = vst [vmem:[#allocation2] sm:$0x1] %v114_v43  ;;  %v118_v44 = vld [vmem:[%s117_s25] sm:$0x1]  ;;  %v2090_v49 = vld [vmem:[#allocation12 + $0x90] sm:$0xff]  ;;  %v154_v51 = vld [vmem:[#allocation10 + $0x48] sm:$0xff] }
  0x2c   :  { %227 = vmatpush.msra.mxu1 %v173_v27  ;;  %320 = vmatpush.msra.mxu3 %v2076_v32  ;;  %v122_v45 = vld [vmem:[%s121_s26] sm:$0x1]  ;;  %119 = vst [vmem:[#allocation2 + $0x1] sm:$0x1] %v118_v44  ;;  %v158_v54 = vld [vmem:[#allocation10 + $0x68] sm:$0xff]  ;;  %v151_v57 = vld [vmem:[#allocation10 + $0x30] sm:$0xff] }
  0x2d   :  { %209 = vmatpush.msra.mxu0 %v166_v29  ;;  %249 = vmatpush.msra.mxu2 %v168_v30  ;;  %v126_v46 = vld [vmem:[%s125_s3] sm:$0x1]  ;;  %123 = vst [vmem:[#allocation2 + $0x2] sm:$0x1] %v122_v45  ;;  %v153_v58 = vld [vmem:[#allocation10 + $0x40] sm:$0xff]  ;;  %v155_v59 = vld [vmem:[#allocation10 + $0x50] sm:$0xff] }
  0x2e   :  { %228 = vmatpush.msra.mxu1 %v170_v31  ;;  %321 = vmatpush.msra.mxu3 %v2079_v38  ;;  %v130_v47 = vld [vmem:[%s129_s27] sm:$0x1]  ;;  %127 = vst [vmem:[#allocation2 + $0x3] sm:$0x1] %v126_v46  ;;  %v2099_v60 = vld [vmem:[#allocation12 + $0x60] sm:$0xff]  ;;  %v150_v62 = vld [vmem:[#allocation10 + $0x28] sm:$0xff] }
  0x2f   :  { %210 = vmatpush.msra.mxu0 %v163_v33  ;;  %250 = vmatpush.msra.mxu2 %v165_v34  ;;  %v134_v50 = vld [vmem:[%s133_s28] sm:$0x1]  ;;  %131 = vst [vmem:[#allocation2 + $0x4] sm:$0x1] %v130_v47  ;;  %v2102_v0 = vld [vmem:[#allocation12 + $0x48] sm:$0xff]  ;;  %v145_v1 = vld [vmem:[#allocation10] sm:$0xff] }
  0x30   :  { %229 = vmatpush.msra.mxu1 %v167_v37  ;;  %v156_v52 = vld [vmem:[#allocation10 + $0x58] sm:$0xff]  ;;  %322 = vmatpush.msra.mxu3 %v2082_v42  ;;  %135 = vst [vmem:[#allocation2 + $0x5] sm:$0x1] %v134_v50  ;;  %v147_v2 = vld [vmem:[#allocation10 + $0x10] sm:$0xff]  ;;  %v149_v4 = vld [vmem:[#allocation10 + $0x20] sm:$0xff] }
  0x31   :  { %211 = vmatpush.msra.mxu0 %v160_v35  ;;  %251 = vmatpush.msra.mxu2 %v162_v36  ;;  %v138_v53 = vld [vmem:[%s137_s29] sm:$0x1]  ;;  %v2105_v3 = vld [vmem:[#allocation12 + $0x170] sm:$0xff]  ;;  %v146_v7 = vld [vmem:[#allocation10 + $0x8] sm:$0xff] }
  0x32   :  { %230 = vmatpush.msra.mxu1 %v164_v41  ;;  %v2095_v55 = vld [vmem:[#allocation12 + $0x78] sm:$0xff]  ;;  %323 = vmatpush.msra.mxu3 %v2090_v49  ;;  %139 = vst [vmem:[#allocation2 + $0x6] sm:$0x1] %v138_v53  ;;  %v2108_v5 = vld [vmem:[#allocation12 + $0x30] sm:$0xff]  ;;  %v2113_v9 = vld [vmem:[#allocation12 + $0x140] sm:$0xff] }
  0x33   :  { %212 = vmatpush.msra.mxu0 %v157_v39  ;;  %252 = vmatpush.msra.mxu2 %v159_v40  ;;  %v142_v56 = vld [vmem:[%s141_s30] sm:$0x1]  ;;  %v2122_v13 = vld [vmem:[#allocation12 + $0x128] sm:$0xff]  ;;  %v2125_v15 = vld [vmem:[#allocation12] sm:$0xff] }
  0x34   :  { %231 = vmatpush.msra.mxu1 %v161_v48  ;;  %v148_v61 = vld [vmem:[#allocation10 + $0x18] sm:$0xff]  ;;  %324 = vmatpush.msra.mxu3 %v2095_v55  ;;  %143 = vst [vmem:[#allocation2 + $0x7] sm:$0x1] %v142_v56  ;;  %v2127_v17 = vld [vmem:[#allocation12 + $0x160] sm:$0xff]  ;;  %v2130_v18 = vld [vmem:[#allocation12 + $0x110] sm:$0xff] }
  0x35   :  { %213 = vmatpush.msra.mxu0 %v154_v51  ;;  %253 = vmatpush.msra.mxu2 %v156_v52  ;;  %v152_v63 = vld [vmem:[#allocation10 + $0x38] sm:$0xff]  ;;  %v2139_v21 = vld [vmem:[#allocation12 + $0x148] sm:$0xff]  ;;  %v2148_v23 = vld [vmem:[#allocation12 + $0x130] sm:$0xff] }
  0x36   :  { %232 = vmatpush.msra.mxu1 %v158_v54  ;;  %325 = vmatpush.msra.mxu3 %v2099_v60  ;;  %v2110_v6 = vld [vmem:[#allocation12 + $0x158] sm:$0xff]  ;;  %v2150_v25 = vld [vmem:[#allocation12 + $0xe0] sm:$0xff]  ;;  %v2158_v27 = vld [vmem:[#allocation12 + $0xc8] sm:$0xff] }
  0x37   :  { %214 = vmatpush.msra.mxu0 %v151_v57  ;;  %254 = vmatpush.msra.mxu2 %v153_v58  ;;  %v2118_v10 = vld [vmem:[#allocation12 + $0x18] sm:$0xff]  ;;  %v2163_v29 = vld [vmem:[#allocation12 + $0x100] sm:$0xff]  ;;  %v2166_v30 = vld [vmem:[#allocation12 + $0xb0] sm:$0xff] }
  0x38   :  { %233 = vmatpush.msra.mxu1 %v155_v59  ;;  %326 = vmatpush.msra.mxu3 %v2102_v0  ;;  %v2120_v12 = vld [vmem:[#allocation12 + $0x178] sm:$0xff]  ;;  %v2171_v31 = vld [vmem:[#allocation12 + $0xe8] sm:$0xff]  ;;  %v2179_v34 = vld [vmem:[#allocation12 + $0xd0] sm:$0xff] }
  0x39   :  { %215 = vmatpush.msra.mxu0 %v148_v61  ;;  %255 = vmatpush.msra.mxu2 %v150_v62  ;;  %v2135_v19 = vld [vmem:[%s2751_s2] sm:$0x1]  ;;  %v2182_v35 = vld [vmem:[#allocation12 + $0x80] sm:$0xff]  ;;  %v2190_v37 = vld [vmem:[#allocation12 + $0x68] sm:$0xff] }
  0x3a   :  { %234 = vmatpush.msra.mxu1 %v152_v63  ;;  %327 = vmatpush.msra.mxu3 %v2108_v5  ;;  %v2143_v22 = vld [vmem:[#allocation12 + $0xf8] sm:$0xff]  ;;  %v2195_v39 = vld [vmem:[#allocation12 + $0xa0] sm:$0xff]  ;;  %v2198_v40 = vld [vmem:[#allocation12 + $0x50] sm:$0xff] }
  0x3b   :  { %216 = vmatpush.msra.mxu0 %v145_v1  ;;  %256 = vmatpush.msra.mxu2 %v147_v2  ;;  %v144_v8 = vld [vmem:[#allocation2] sm:$0xff]  ;;  %v2203_v41 = vld [vmem:[#allocation12 + $0x88] sm:$0xff]  ;;  %v2211_v44 = vld [vmem:[#allocation12 + $0x70] sm:$0xff] }
  0x3c   :  { %235 = vmatpush.msra.mxu1 %v149_v4  ;;  %257 = vmatmul.f32.vlgmr.msra.gmra.mxu2 %v144_v8  ;;  %v2155_v26 = vld [vmem:[#allocation12 + $0x118] sm:$0xff]  ;;  %v2214_v45 = vld [vmem:[#allocation12 + $0x20] sm:$0xff]  ;;  %v2222_v47 = vld [vmem:[#allocation12 + $0x8] sm:$0xff] }
  0x3d   :  { %334 = vmatpush.msrb.mxu0 %v2105_v3  ;;  %477 = vmatpush.msrb.mxu2 %v2047_v11  ;;  %v2174_v33 = vld [vmem:[#allocation12 + $0x98] sm:$0xff]  ;;  %v2227_v48 = vld [vmem:[#allocation12 + $0x40] sm:$0xff]  ;;  %v2233_v50 = vld [vmem:[#allocation12 + $0x28] sm:$0xff] }
  0x3e   :  { %236 = vmatpush.msra.mxu1 %v146_v7  ;;  %217 = vmatmul.f32.vlgmr.msra.gmra.mxu0 %v144_v8  ;;  %v2187_v36 = vld [vmem:[#allocation12 + $0xb8] sm:$0xff]  ;;  %v2238_v51 = vld [vmem:[#allocation12 + $0x10] sm:$0xff] }
  0x3f   :  { %335 = vmatpush.msrb.mxu0 %v2110_v6  ;;  %237 = vmatmul.f32.vlgmr.msra.gmra.mxu1 %v144_v8  ;;  %v2206_v43 = vld [vmem:[#allocation12 + $0x38] sm:$0xff] }
  0x40   :  { %328 = vmatpush.msra.mxu3 %v2118_v10  ;;  %354 = vmatpush.msrb.mxu1 %v2120_v12  ;;  %v2219_v46 = vld [vmem:[#allocation12 + $0x58] sm:$0xff] }
  0x41   :  { %336 = vmatpush.msrb.mxu0 %v2113_v9  ;;  %478 = vmatpush.msrb.mxu2 %v2052_v14 }
  0x42   :  { %329 = vmatpush.msra.mxu3 %v2125_v15  ;;  %355 = vmatpush.msrb.mxu1 %v2127_v17 }
  0x43   :  { %337 = vmatpush.msrb.mxu0 %v2122_v13  ;;  %330 = vmatmul.f32.vlgmr.msra.gmra.mxu3 %v2135_v19 }
  0x44   :  { %356 = vmatpush.msrb.mxu1 %v2139_v21  ;;  %497 = vmatpush.msrb.mxu3 %v2105_v3 }
  0x45   :  { %338 = vmatpush.msrb.mxu0 %v2130_v18  ;;  %479 = vmatpush.msrb.mxu2 %v2056_v16 }
  0x46   :  { %357 = vmatpush.msrb.mxu1 %v2148_v23  ;;  %498 = vmatpush.msrb.mxu3 %v2110_v6 }
  0x47   :  { %339 = vmatpush.msrb.mxu0 %v2143_v22  ;;  %480 = vmatpush.msrb.mxu2 %v2063_v20 }
  0x48   :  { %358 = vmatpush.msrb.mxu1 %v2155_v26  ;;  %499 = vmatpush.msrb.mxu3 %v2113_v9 }
  0x49   :  { %340 = vmatpush.msrb.mxu0 %v2150_v25  ;;  %481 = vmatpush.msrb.mxu2 %v2070_v24 }
  0x4a   :  { %359 = vmatpush.msrb.mxu1 %v2163_v29  ;;  %500 = vmatpush.msrb.mxu3 %v2122_v13 }
  0x4b   :  { %341 = vmatpush.msrb.mxu0 %v2158_v27  ;;  %482 = vmatpush.msrb.mxu2 %v2073_v28 }
  0x4c   :  { %360 = vmatpush.msrb.mxu1 %v2171_v31  ;;  %501 = vmatpush.msrb.mxu3 %v2130_v18 }
  0x4d   :  { %342 = vmatpush.msrb.mxu0 %v2166_v30  ;;  %483 = vmatpush.msrb.mxu2 %v2076_v32 }
  0x4e   :  { %361 = vmatpush.msrb.mxu1 %v2179_v34  ;;  %502 = vmatpush.msrb.mxu3 %v2143_v22 }
  0x4f   :  { %343 = vmatpush.msrb.mxu0 %v2174_v33  ;;  %484 = vmatpush.msrb.mxu2 %v2079_v38 }
  0x50   :  { %362 = vmatpush.msrb.mxu1 %v2187_v36  ;;  %503 = vmatpush.msrb.mxu3 %v2150_v25 }
  0x51   :  { %344 = vmatpush.msrb.mxu0 %v2182_v35  ;;  %485 = vmatpush.msrb.mxu2 %v2082_v42 }
  0x52   :  { %363 = vmatpush.msrb.mxu1 %v2195_v39  ;;  %504 = vmatpush.msrb.mxu3 %v2158_v27 }
  0x53   :  { %345 = vmatpush.msrb.mxu0 %v2190_v37  ;;  %486 = vmatpush.msrb.mxu2 %v2090_v49 }
  0x54   :  { %364 = vmatpush.msrb.mxu1 %v2203_v41  ;;  %505 = vmatpush.msrb.mxu3 %v2166_v30 }
  0x55   :  { %346 = vmatpush.msrb.mxu0 %v2198_v40  ;;  %487 = vmatpush.msrb.mxu2 %v2095_v55 }
  0x56   :  { %365 = vmatpush.msrb.mxu1 %v2211_v44  ;;  %506 = vmatpush.msrb.mxu3 %v2174_v33 }
  0x57   :  { %347 = vmatpush.msrb.mxu0 %v2206_v43  ;;  %488 = vmatpush.msrb.mxu2 %v2099_v60 }
  0x58   :  { %366 = vmatpush.msrb.mxu1 %v2219_v46  ;;  %507 = vmatpush.msrb.mxu3 %v2182_v35 }
  0x59   :  { %348 = vmatpush.msrb.mxu0 %v2214_v45  ;;  %489 = vmatpush.msrb.mxu2 %v2102_v0 }
  0x5a   :  { %367 = vmatpush.msrb.mxu1 %v2227_v48  ;;  %508 = vmatpush.msrb.mxu3 %v2190_v37 }
  0x5b   :  { %349 = vmatpush.msrb.mxu0 %v2222_v47  ;;  %490 = vmatpush.msrb.mxu2 %v2108_v5 }
  0x5c   :  { %350 = vmatmul.f32.vlgmr.msrb.gmra.mxu0 %v2135_v19  ;;  %368 = vmatpush.msrb.mxu1 %v2233_v50 }
  0x5d   :  { %517 = vmatpush.msra.mxu0 %v2120_v12  ;;  %509 = vmatpush.msrb.mxu3 %v2198_v40 }
  0x5e   :  { %369 = vmatpush.msrb.mxu1 %v2238_v51  ;;  %491 = vmatpush.msrb.mxu2 %v2118_v10 }
  0x5f   :  { %518 = vmatpush.msra.mxu0 %v2127_v17  ;;  %370 = vmatmul.f32.vlgmr.msrb.gmra.mxu1 %v2135_v19 }
  0x60   :  { %510 = vmatpush.msrb.mxu3 %v2206_v43  ;;  %492 = vmatpush.msrb.mxu2 %v2125_v15 }
  0x61   :  { %519 = vmatpush.msra.mxu0 %v2139_v21  ;;  %641 = vmatpush.msra.mxu1 %v2047_v11  ;;  %v193_v11 = vld [vmem:[%s2754_s5] sm:$0x7] }
  0x62   :  { %511 = vmatpush.msrb.mxu3 %v2214_v45  ;;  %661 = vmatpush.msra.mxu2 %v2105_v3 }
  0x63   :  { %520 = vmatpush.msra.mxu0 %v2148_v23  ;;  %642 = vmatpush.msra.mxu1 %v2052_v14  ;;  %v195_v14 = vperm.slane %v193_v11, 0 }
  0x64   :  { %512 = vmatpush.msrb.mxu3 %v2222_v47  ;;  %662 = vmatpush.msra.mxu2 %v2110_v6 }
  0x65   :  { %521 = vmatpush.msra.mxu0 %v2155_v26  ;;  %643 = vmatpush.msra.mxu1 %v2056_v16  ;;  %v196_v16 = vperm.slane %v193_v11, 1 }
  0x66   :  { %681 = vmatpush.msra.mxu3 %v2120_v12  ;;  %663 = vmatpush.msra.mxu2 %v2113_v9 }
  0x67   :  { %522 = vmatpush.msra.mxu0 %v2163_v29  ;;  %644 = vmatpush.msra.mxu1 %v2063_v20 }
  0x68   :  { %682 = vmatpush.msra.mxu3 %v2127_v17  ;;  %664 = vmatpush.msra.mxu2 %v2122_v13 }
  0x69   :  { %523 = vmatpush.msra.mxu0 %v2171_v31  ;;  %645 = vmatpush.msra.mxu1 %v2070_v24 }
  0x6a   :  { %683 = vmatpush.msra.mxu3 %v2139_v21  ;;  %665 = vmatpush.msra.mxu2 %v2130_v18 }
  0x6b   :  { %524 = vmatpush.msra.mxu0 %v2179_v34  ;;  %646 = vmatpush.msra.mxu1 %v2073_v28 }
  0x6c   :  { %684 = vmatpush.msra.mxu3 %v2148_v23  ;;  %666 = vmatpush.msra.mxu2 %v2143_v22 }
  0x6d   :  { %525 = vmatpush.msra.mxu0 %v2187_v36  ;;  %647 = vmatpush.msra.mxu1 %v2076_v32 }
  0x6e   :  { %685 = vmatpush.msra.mxu3 %v2155_v26  ;;  %667 = vmatpush.msra.mxu2 %v2150_v25 }
  0x6f   :  { %526 = vmatpush.msra.mxu0 %v2195_v39  ;;  %648 = vmatpush.msra.mxu1 %v2079_v38  ;;  %v197_v38 = vperm.slane %v193_v11, 2 }
  0x70   :  { %686 = vmatpush.msra.mxu3 %v2163_v29  ;;  %668 = vmatpush.msra.mxu2 %v2158_v27 }
  0x71   :  { %527 = vmatpush.msra.mxu0 %v2203_v41  ;;  %649 = vmatpush.msra.mxu1 %v2082_v42 }
  0x72   :  { %687 = vmatpush.msra.mxu3 %v2171_v31  ;;  %669 = vmatpush.msra.mxu2 %v2166_v30 }
  0x73   :  { %528 = vmatpush.msra.mxu0 %v2211_v44  ;;  %650 = vmatpush.msra.mxu1 %v2090_v49 }
  0x74   :  { %688 = vmatpush.msra.mxu3 %v2179_v34  ;;  %670 = vmatpush.msra.mxu2 %v2174_v33 }
  0x75   :  { %529 = vmatpush.msra.mxu0 %v2219_v46  ;;  %651 = vmatpush.msra.mxu1 %v2095_v55 }
  0x76   :  { %689 = vmatpush.msra.mxu3 %v2187_v36  ;;  %671 = vmatpush.msra.mxu2 %v2182_v35 }
  0x77   :  { %530 = vmatpush.msra.mxu0 %v2227_v48  ;;  %652 = vmatpush.msra.mxu1 %v2099_v60 }
  0x78   :  { %690 = vmatpush.msra.mxu3 %v2195_v39  ;;  %672 = vmatpush.msra.mxu2 %v2190_v37 }
  0x79   :  { %531 = vmatpush.msra.mxu0 %v2233_v50  ;;  %653 = vmatpush.msra.mxu1 %v2102_v0 }
  0x7a   :  { %691 = vmatpush.msra.mxu3 %v2203_v41  ;;  %673 = vmatpush.msra.mxu2 %v2198_v40 }
  0x7b   :  { %532 = vmatpush.msra.mxu0 %v2238_v51  ;;  %654 = vmatpush.msra.mxu1 %v2108_v5 }
  0x7c   :  { %692 = vmatpush.msra.mxu3 %v2211_v44  ;;  %674 = vmatpush.msra.mxu2 %v2206_v43 }
  0x7d   :  { %655 = vmatpush.msra.mxu1 %v2118_v10 }
  0x7e   :  { %693 = vmatpush.msra.mxu3 %v2219_v46  ;;  %675 = vmatpush.msra.mxu2 %v2214_v45 }
  0x7f   :  { %656 = vmatpush.msra.mxu1 %v2125_v15 }
  0x80   :  { %694 = vmatpush.msra.mxu3 %v2227_v48  ;;  %676 = vmatpush.msra.mxu2 %v2222_v47 }
  0x81   :  { %825 = vmatpush.msrb.mxu1 %v2105_v3 }
  0x82   :  { %695 = vmatpush.msra.mxu3 %v2233_v50 }
  0x83   :  { %826 = vmatpush.msrb.mxu1 %v2110_v6  ;;  %v2337_v6 = vld [vmem:[%s2755_s6] sm:$0x1] }
  0x84   :  { %696 = vmatpush.msra.mxu3 %v2238_v51 }
  0x85   :  { %827 = vmatpush.msrb.mxu1 %v2113_v9 }
  0x87   :  { %828 = vmatpush.msrb.mxu1 %v2122_v13 }
  0x89   :  { %829 = vmatpush.msrb.mxu1 %v2130_v18 }
  0x8b   :  { %830 = vmatpush.msrb.mxu1 %v2143_v22 }
  0x8d   :  { %831 = vmatpush.msrb.mxu1 %v2150_v25 }
  0x8f   :  { %832 = vmatpush.msrb.mxu1 %v2158_v27 }
  0x91   :  { %833 = vmatpush.msrb.mxu1 %v2166_v30 }
  0x93   :  { %834 = vmatpush.msrb.mxu1 %v2174_v33 }
  0x95   :  { %835 = vmatpush.msrb.mxu1 %v2182_v35 }
  0x97   :  { %836 = vmatpush.msrb.mxu1 %v2190_v37 }
  0x99   :  { %837 = vmatpush.msrb.mxu1 %v2198_v40 }
  0x9b   :  { %838 = vmatpush.msrb.mxu1 %v2206_v43 }
  0x9d   :  { %839 = vmatpush.msrb.mxu1 %v2214_v45 }
  0x9f   :  { %840 = vmatpush.msrb.mxu1 %v2222_v47 }
  0xbb   :  { %v218_v20 = vpop.f32.mrf.mxu0 }
  0xbc   :  { %v219_v24 = vadd.f32 %v218_v20, %v195_v14  ;;  %v238_v28 = vpop.f32.mrf.mxu1 }
  0xbd   :  { %v239_v32 = vadd.f32 %v238_v28, %v196_v16 }
  0xbe   :  { %261 = vst [vmem:[#allocation3] sm:$0xff] %v219_v24 }
  0xbf   :  { %262 = vst [vmem:[#allocation3 + $0x8] sm:$0xff] %v239_v32  ;;  %v258_v42 = vpop.f32.mrf.mxu2 }
  0xc0   :  { %v259_v49 = vadd.f32 %v258_v42, %v197_v38 }
  0xc2   :  { %263 = vst [vmem:[#allocation3 + $0x10] sm:$0xff] %v259_v49 }
  0xc6   :  { %v331_v52 = vpop.f32.mrf.mxu3 }
  0xc9   :  { %v374_v53 = vld [vmem:[#allocation3] ss:$8 sm:$0x7] }
  0xca   :  { %v375_v54 = vadd.f32 %v374_v53, %v331_v52  ;;  %v396_v58 = vrot.slane %v374_v53, 1  ;;  %v420_v37 = vrot.slane %v374_v53, 2 }
  0xcc   :  { %v1681_v55 = vmul.f32 -1.442695, %v375_v54 }
  0xce   :  { %1709 = vpow2.f32 %v1681_v55 }
  0xd4   :  { %v1710_v56 = vpop.eup %1709 }
  0xd5   :  { %v379_v57 = vadd.f32 1.0, %v1710_v56 }
  0xd7   :  { %1711 = vrcp.f32 %v379_v57  ;;  %v391_v9 = vand.u32 2147483648, %v379_v57  ;;  %vm385_vm0 = vweird.f32 %v379_v57  ;;  %v389_v13 = vand.u32 2147483647, %v379_v57 }
  0xd9   :  { %v351_v59 = vpop.f32.mrf.mxu0  ;;  %v392_v25 = vor.u32 1.1754944e-38, %v391_v9  ;;  %vm390_vm3 = vcmp.eq.f32.partialorder %v389_v13, 8.507059e+37 }
  0xda   :  { %v398_v61 = vadd.f32 %v396_v58, %v351_v59 }
  0xdc   :  { %v1682_v62 = vmul.f32 -1.442695, %v398_v61  ;;  %v371_v7 = vpop.f32.mrf.mxu1 }
  0xdd   :  { %v1712_v63 = vpop.eup %1711  ;;  %v418_v22 = vadd.f32 %v371_v7, %v2337_v6 }
  0xde   :  { %1713 = vpow2.f32 %v1682_v62  ;;  %v381_v1 = vmul.f32 %v1712_v63, %v379_v57  ;;  %vm386_vm1 = vweird.f32 %v1712_v63 }
  0xdf   :  { %vm387_vm2 = vmor %vm385_vm0, %vm386_vm1 }
  0xe0   :  { %v382_v2 = vsub.f32 1.0, %v381_v1 }
  0xe2   :  { %v383_v8 = vmul.f32 %v1712_v63, %v382_v2 }
  0xe4   :  { %v1714_v3 = vpop.eup %1713  ;;  %v384_v18 = vadd.f32 %v1712_v63, %v383_v8 }
  0xe5   :  { %v402_v4 = vadd.f32 1.0, %v1714_v3 }
  0xe6   :  { %v388_v27 = vsel %vm387_vm2, %v1712_v63, %v384_v18 }
  0xe7   :  { %1715 = vrcp.f32 %v402_v4  ;;  %v393_v30 = vsel %vm390_vm3, %v392_v25, %v388_v27  ;;  %v414_v47 = vand.u32 2147483648, %v402_v4  ;;  %v412_v14 = vand.u32 2147483647, %v402_v4 }
  0xe8   :  { %v419_v33 = vmul.f32 %v418_v22, %v393_v30  ;;  %vm408_vm5 = vweird.f32 %v402_v4 }
  0xe9   :  { %v415_v20 = vor.u32 1.1754944e-38, %v414_v47  ;;  %vm413_vm7 = vcmp.eq.f32.partialorder %v412_v14, 8.507059e+37  ;;  %v2390_v47 = vld [vmem:[#allocation12 + $0x108] sm:$0xff]  ;;  %v2400_v14 = vld [vmem:[#allocation12 + $0xd8] sm:$0xff] }
  0xea   :  { %v422_v43 = vadd.f32 %v420_v37, %v419_v33  ;;  %v2371_v37 = vld [vmem:[#allocation12 + $0x168] sm:$0xff] }
  0xeb   :  { %805 = vmatpush.msrb.mxu0 %v2371_v37 }
  0xec   :  { %1717 = vtanh.f32 %v422_v43  ;;  %v2380_v43 = vld [vmem:[#allocation12 + $0x138] sm:$0xff] }
  0xed   :  { %v1716_v35 = vpop.eup %1715 }
  0xee   :  { %v404_v40 = vmul.f32 %v1716_v35, %v402_v4  ;;  %vm409_vm4 = vweird.f32 %v1716_v35 }
  0xef   :  { %vm410_vm6 = vmor %vm408_vm5, %vm409_vm4 }
  0xf0   :  { %v405_v45 = vsub.f32 1.0, %v404_v40  ;;  %v2375_v40 = vld [vmem:[#allocation12 + $0x150] sm:$0xff] }
  0xf1   :  { %806 = vmatpush.msrb.mxu0 %v2375_v40 }
  0xf2   :  { %v406_v11 = vmul.f32 %v1716_v35, %v405_v45  ;;  %v1718_v38 = vpop.eup %1717  ;;  %v2385_v45 = vld [vmem:[#allocation12 + $0x120] sm:$0xff] }
  0xf3   :  { %807 = vmatpush.msrb.mxu0 %v2380_v43 }
  0xf4   :  { %v407_v16 = vadd.f32 %v1716_v35, %v406_v11  ;;  %v2395_v11 = vld [vmem:[#allocation12 + $0xf0] sm:$0xff] }
  0xf5   :  { %808 = vmatpush.msrb.mxu0 %v2385_v45 }
  0xf6   :  { %v411_v24 = vsel %vm410_vm6, %v1716_v35, %v407_v16  ;;  %v2405_v16 = vld [vmem:[#allocation12 + $0xc0] sm:$0xff] }
  0xf7   :  { %v416_v28 = vsel %vm413_vm7, %v415_v20, %v411_v24  ;;  %809 = vmatpush.msrb.mxu0 %v2390_v47  ;;  %v2408_v24 = vld [vmem:[#allocation3 + $0x2] ss:$8 sm:$0x7] }
  0xf8   :  { %v424_v32 = vsub.f32 1.0, %v416_v28  ;;  %v426_v49 = vmul.f32 %v416_v28, %v2135_v19 }
  0xf9   :  { %810 = vmatpush.msrb.mxu0 %v2395_v11 }
  0xfa   :  { %v425_v42 = vmul.f32 %v1718_v38, %v424_v32  ;;  %v2413_v32 = vld [vmem:[#allocation12 + $0xa8] sm:$0xff] }
  0xfb   :  { %811 = vmatpush.msrb.mxu0 %v2400_v14 }
  0xfc   :  { %v2341_v52 = vadd.f32 %v426_v49, %v425_v42  ;;  %v2418_v42 = vld [vmem:[#allocation12 + $0x90] sm:$0xff]  ;;  %v724_v49 = vrot.slane %v2408_v24, 1 }
  0xfd   :  { %812 = vmatpush.msrb.mxu0 %v2405_v16 }
  0xfe   :  { %428 = vst [vmem:[#allocation4] sm:$0x1] %v2341_v52  ;;  %493 = vmatmul.f32.vlgmr.msrb.gmra.mxu2 %v2341_v52  ;;  %513 = vmatmul.f32.vlgmr.msrb.gmra.mxu3 %v2341_v52 }
  0xff   :  { %533 = vmatmul.f32.vlgmr.msra.gmra.mxu0 %v2341_v52  ;;  %845 = vmatpush.msrb.mxu2 %v2120_v12  ;;  %v538_v12 = vld [vmem:[#allocation3 + $0x1] ss:$8 sm:$0x7] }
 0x100   :  { %v584_v4 = vrot.slane %v538_v12, 2  ;;  %969 = vmatpush.msrb.mxu3 %v2371_v37  ;;  %813 = vmatpush.msrb.mxu0 %v2413_v32 }
 0x101   :  { %846 = vmatpush.msrb.mxu2 %v2127_v17  ;;  %v560_v17 = vrot.slane %v538_v12, 1 }
 0x102   :  { %970 = vmatpush.msrb.mxu3 %v2375_v40  ;;  %814 = vmatpush.msrb.mxu0 %v2418_v42 }
 0x103   :  { %847 = vmatpush.msrb.mxu2 %v2139_v21 }
 0x104   :  { %971 = vmatpush.msrb.mxu3 %v2380_v43 }
 0x105   :  { %848 = vmatpush.msrb.mxu2 %v2148_v23 }
 0x106   :  { %972 = vmatpush.msrb.mxu3 %v2385_v45 }
 0x107   :  { %849 = vmatpush.msrb.mxu2 %v2155_v26 }
 0x108   :  { %973 = vmatpush.msrb.mxu3 %v2390_v47 }
 0x109   :  { %850 = vmatpush.msrb.mxu2 %v2163_v29 }
 0x10a   :  { %974 = vmatpush.msrb.mxu3 %v2395_v11 }
 0x10b   :  { %851 = vmatpush.msrb.mxu2 %v2171_v31 }
 0x10c   :  { %975 = vmatpush.msrb.mxu3 %v2400_v14 }
 0x10d   :  { %852 = vmatpush.msrb.mxu2 %v2179_v34 }
 0x10e   :  { %976 = vmatpush.msrb.mxu3 %v2405_v16 }
 0x10f   :  { %853 = vmatpush.msrb.mxu2 %v2187_v36 }
 0x110   :  { %977 = vmatpush.msrb.mxu3 %v2413_v32 }
 0x111   :  { %854 = vmatpush.msrb.mxu2 %v2195_v39 }
 0x112   :  { %978 = vmatpush.msrb.mxu3 %v2418_v42 }
 0x113   :  { %855 = vmatpush.msrb.mxu2 %v2203_v41 }
 0x115   :  { %856 = vmatpush.msrb.mxu2 %v2211_v44 }
 0x117   :  { %857 = vmatpush.msrb.mxu2 %v2219_v46 }
 0x119   :  { %858 = vmatpush.msrb.mxu2 %v2227_v48 }
 0x11b   :  { %859 = vmatpush.msrb.mxu2 %v2233_v50 }
 0x11d   :  { %860 = vmatpush.msrb.mxu2 %v2238_v51 }
 0x17c   :  { %v534_v57 = vpop.f32.mrf.mxu0 }
 0x17d   :  { %v582_v62 = vadd.f32 %v534_v57, %v2337_v6 }
 0x181   :  { %v494_v19 = vpop.f32.mrf.mxu2  ;;  %v514_v21 = vpop.f32.mrf.mxu3 }
 0x182   :  { %v539_v23 = vadd.f32 %v538_v12, %v494_v19  ;;  %v562_v26 = vadd.f32 %v560_v17, %v514_v21 }
 0x184   :  { %v1683_v29 = vmul.f32 -1.442695, %v539_v23  ;;  %v1684_v31 = vmul.f32 -1.442695, %v562_v26 }
 0x186   :  { %1719 = vpow2.f32 %v1683_v29 }
 0x187   :  { %1721 = vpow2.f32 %v1684_v31 }
 0x18c   :  { %v1720_v34 = vpop.eup %1719 }
 0x18d   :  { %v1722_v36 = vpop.eup %1721  ;;  %v543_v39 = vadd.f32 1.0, %v1720_v34 }
 0x18e   :  { %v566_v41 = vadd.f32 1.0, %v1722_v36 }
 0x18f   :  { %1723 = vrcp.f32 %v543_v39  ;;  %v555_v53 = vand.u32 2147483648, %v543_v39  ;;  %v553_v56 = vand.u32 2147483647, %v543_v39  ;;  %vm549_vm9 = vweird.f32 %v543_v39 }
 0x190   :  { %1725 = vrcp.f32 %v566_v41  ;;  %v578_v7 = vand.u32 2147483648, %v566_v41  ;;  %vm572_vm13 = vweird.f32 %v566_v41  ;;  %v576_v8 = vand.u32 2147483647, %v566_v41 }
 0x191   :  { %v556_v61 = vor.u32 1.1754944e-38, %v555_v53  ;;  %vm554_vm11 = vcmp.eq.f32.partialorder %v553_v56, 8.507059e+37 }
 0x192   :  { %v579_v18 = vor.u32 1.1754944e-38, %v578_v7  ;;  %vm577_vm15 = vcmp.eq.f32.partialorder %v576_v8, 8.507059e+37  ;;  %v2444_v8 = vld [vmem:[#allocation12 + $0x170] sm:$0xff] }
 0x195   :  { %v1724_v44 = vpop.eup %1723 }
 0x196   :  { %v1726_v46 = vpop.eup %1725  ;;  %v545_v48 = vmul.f32 %v1724_v44, %v543_v39  ;;  %vm550_vm8 = vweird.f32 %v1724_v44 }
 0x197   :  { %v568_v50 = vmul.f32 %v1726_v46, %v566_v41  ;;  %vm551_vm10 = vmor %vm549_vm9, %vm550_vm8  ;;  %vm573_vm12 = vweird.f32 %v1726_v46 }
 0x198   :  { %v546_v51 = vsub.f32 1.0, %v545_v48  ;;  %vm574_vm14 = vmor %vm572_vm13, %vm573_vm12 }
 0x199   :  { %v569_v54 = vsub.f32 1.0, %v568_v50 }
 0x19a   :  { %v547_v55 = vmul.f32 %v1724_v44, %v546_v51  ;;  %v748_v51 = vrot.slane %v2408_v24, 2 }
 0x19b   :  { %v570_v58 = vmul.f32 %v1726_v46, %v569_v54 }
 0x19c   :  { %v548_v59 = vadd.f32 %v1724_v44, %v547_v55 }
 0x19d   :  { %v571_v2 = vadd.f32 %v1726_v46, %v570_v58 }
 0x19e   :  { %v552_v63 = vsel %vm551_vm10, %v1724_v44, %v548_v59 }
 0x19f   :  { %v557_v1 = vsel %vm554_vm11, %v556_v61, %v552_v63  ;;  %v575_v13 = vsel %vm574_vm14, %v1726_v46, %v571_v2 }
 0x1a0   :  { %v583_v3 = vmul.f32 %v582_v62, %v557_v1  ;;  %v580_v22 = vsel %vm577_vm15, %v579_v18, %v575_v13  ;;  %v2450_v13 = vld [vmem:[#allocation12 + $0x158] sm:$0xff]  ;;  %v2452_v18 = vld [vmem:[#allocation12 + $0x160] sm:$0xff] }
 0x1a1   :  { %v588_v25 = vsub.f32 1.0, %v580_v22  ;;  %v590_v33 = vmul.f32 %v580_v22, %v2341_v52  ;;  %v2424_v52 = vld [vmem:[#allocation12 + $0x78] sm:$0xff]  ;;  %v2456_v22 = vld [vmem:[#allocation12 + $0x140] sm:$0xff] }
 0x1a2   :  { %v586_v9 = vadd.f32 %v584_v4, %v583_v3  ;;  %815 = vmatpush.msrb.mxu0 %v2424_v52  ;;  %979 = vmatpush.msrb.mxu3 %v2424_v52 }
 0x1a4   :  { %1727 = vtanh.f32 %v586_v9  ;;  %816 = vmatpush.msrb.mxu0 %v2099_v60  ;;  %v2446_v9 = vld [vmem:[#allocation12 + $0x178] sm:$0xff] }
 0x1a6   :  { %817 = vmatpush.msrb.mxu0 %v2102_v0 }
 0x1a8   :  { %818 = vmatpush.msrb.mxu0 %v2108_v5 }
 0x1aa   :  { %v1728_v27 = vpop.eup %1727  ;;  %819 = vmatpush.msrb.mxu0 %v2118_v10 }
 0x1ab   :  { %v589_v30 = vmul.f32 %v1728_v27, %v588_v25  ;;  %v2458_v25 = vld [vmem:[#allocation12 + $0x148] sm:$0xff] }
 0x1ac   :  { %820 = vmatpush.msrb.mxu0 %v2125_v15  ;;  %v2462_v27 = vld [vmem:[#allocation12 + $0x128] sm:$0xff] }
 0x1ad   :  { %v2365_v35 = vadd.f32 %v590_v33, %v589_v30  ;;  %v2464_v30 = vld [vmem:[#allocation12 + $0x130] sm:$0xff] }
 0x1ae   :  { %989 = vmatpush.msra.mxu0 %v2444_v8  ;;  %v2468_v33 = vld [vmem:[#allocation12 + $0x110] sm:$0xff] }
 0x1af   :  { %592 = vst [vmem:[#allocation4 + $0x1] sm:$0x1] %v2365_v35  ;;  %657 = vmatmul.f32.vlgmr.msra.gmra.mxu1 %v2365_v35  ;;  %677 = vmatmul.f32.vlgmr.msra.gmra.mxu2 %v2365_v35 }
 0x1b0   :  { %697 = vmatmul.f32.vlgmr.msra.gmra.mxu3 %v2365_v35  ;;  %1133 = vmatpush.msra.mxu2 %v2371_v37 }
 0x1b1   :  { %1009 = vmatpush.msra.mxu1 %v2446_v9  ;;  %990 = vmatpush.msra.mxu0 %v2450_v13 }
 0x1b2   :  { %1134 = vmatpush.msra.mxu2 %v2375_v40 }
 0x1b3   :  { %1010 = vmatpush.msra.mxu1 %v2452_v18  ;;  %991 = vmatpush.msra.mxu0 %v2456_v22 }
 0x1b4   :  { %1135 = vmatpush.msra.mxu2 %v2380_v43 }
 0x1b5   :  { %1011 = vmatpush.msra.mxu1 %v2458_v25  ;;  %992 = vmatpush.msra.mxu0 %v2462_v27 }
 0x1b6   :  { %1136 = vmatpush.msra.mxu2 %v2385_v45 }
 0x1b7   :  { %1012 = vmatpush.msra.mxu1 %v2464_v30  ;;  %993 = vmatpush.msra.mxu0 %v2468_v33 }
 0x1b8   :  { %1137 = vmatpush.msra.mxu2 %v2390_v47 }
 0x1ba   :  { %1138 = vmatpush.msra.mxu2 %v2395_v11 }
 0x1bc   :  { %1139 = vmatpush.msra.mxu2 %v2400_v14 }
 0x1be   :  { %1140 = vmatpush.msra.mxu2 %v2405_v16 }
 0x1c0   :  { %1141 = vmatpush.msra.mxu2 %v2413_v32 }
 0x1c2   :  { %1142 = vmatpush.msra.mxu2 %v2418_v42 }
 0x1c4   :  { %1143 = vmatpush.msra.mxu2 %v2424_v52 }
 0x22c   :  { %v658_v20 = vpop.f32.mrf.mxu1 }
 0x22d   :  { %v703_v28 = vadd.f32 %v2408_v24, %v658_v20  ;;  %v2474_v20 = vld [vmem:[#allocation12 + $0xf8] sm:$0xff]  ;;  %v2476_v24 = vld [vmem:[#allocation12 + $0x100] sm:$0xff] }
 0x22e   :  { %994 = vmatpush.msra.mxu0 %v2474_v20 }
 0x22f   :  { %v1685_v38 = vmul.f32 -1.442695, %v703_v28  ;;  %v2478_v28 = vld [vmem:[#allocation3 + $0x3] ss:$8 sm:$0x7] }
 0x231   :  { %1729 = vpow2.f32 %v1685_v38  ;;  %v2482_v38 = vld [vmem:[#allocation12 + $0xe0] sm:$0xff] }
 0x232   :  { %v678_v12 = vpop.f32.mrf.mxu2  ;;  %995 = vmatpush.msra.mxu0 %v2482_v38 }
 0x233   :  { %v726_v17 = vadd.f32 %v724_v49, %v678_v12  ;;  %v698_v44 = vpop.f32.mrf.mxu3  ;;  %v2484_v49 = vld [vmem:[#allocation12 + $0xe8] sm:$0xff]  ;;  %v888_v12 = vrot.slane %v2478_v28, 1 }
 0x234   :  { %v746_v15 = vadd.f32 %v698_v44, %v2337_v6  ;;  %v2510_v44 = vld [vmem:[#allocation12 + $0x88] sm:$0xff] }
 0x235   :  { %v1686_v19 = vmul.f32 -1.442695, %v726_v17  ;;  %v2489_v17 = vld [vmem:[#allocation12 + $0xc8] sm:$0xff] }
 0x236   :  { %996 = vmatpush.msra.mxu0 %v2489_v17 }
 0x237   :  { %v1730_v21 = vpop.eup %1729  ;;  %1731 = vpow2.f32 %v1686_v19  ;;  %v2491_v19 = vld [vmem:[#allocation12 + $0xd0] sm:$0xff] }
 0x238   :  { %v707_v23 = vadd.f32 1.0, %v1730_v21 }
 0x23a   :  { %1733 = vrcp.f32 %v707_v23  ;;  %v719_v60 = vand.u32 2147483648, %v707_v23  ;;  %v717_v0 = vand.u32 2147483647, %v707_v23  ;;  %vm713_vm1 = vweird.f32 %v707_v23 }
 0x23c   :  { %v720_v5 = vor.u32 1.1754944e-38, %v719_v60  ;;  %vm718_vm3 = vcmp.eq.f32.partialorder %v717_v0, 8.507059e+37  ;;  %v2504_v0 = vld [vmem:[#allocation12 + $0xa0] sm:$0xff] }
 0x23d   :  { %v1732_v26 = vpop.eup %1731 }
 0x23e   :  { %v730_v29 = vadd.f32 1.0, %v1732_v26 }
 0x240   :  { %v1734_v31 = vpop.eup %1733  ;;  %1735 = vrcp.f32 %v730_v29  ;;  %v742_v55 = vand.u32 2147483648, %v730_v29  ;;  %v740_v57 = vand.u32 2147483647, %v730_v29  ;;  %vm736_vm5 = vweird.f32 %v730_v29 }
 0x241   :  { %v709_v34 = vmul.f32 %v1734_v31, %v707_v23  ;;  %vm714_vm0 = vweird.f32 %v1734_v31 }
 0x242   :  { %vm715_vm2 = vmor %vm713_vm1, %vm714_vm0  ;;  %v743_v61 = vor.u32 1.1754944e-38, %v742_v55  ;;  %vm741_vm7 = vcmp.eq.f32.partialorder %v740_v57, 8.507059e+37  ;;  %v2541_v57 = vld [vmem:[#allocation12 + $0x20] sm:$0xff] }
 0x243   :  { %v710_v36 = vsub.f32 1.0, %v709_v34  ;;  %v2498_v34 = vld [vmem:[#allocation12 + $0xb8] sm:$0xff] }
 0x245   :  { %v711_v39 = vmul.f32 %v1734_v31, %v710_v36 }
 0x246   :  { %v1736_v41 = vpop.eup %1735 }
 0x247   :  { %v732_v46 = vmul.f32 %v1736_v41, %v730_v29  ;;  %v712_v48 = vadd.f32 %v1734_v31, %v711_v39  ;;  %vm737_vm4 = vweird.f32 %v1736_v41  ;;  %v2502_v39 = vld [vmem:[#allocation12 + $0x98] sm:$0xff] }
 0x248   :  { %vm738_vm6 = vmor %vm736_vm5, %vm737_vm4 }
 0x249   :  { %v733_v10 = vsub.f32 1.0, %v732_v46  ;;  %v716_v50 = vsel %vm715_vm2, %v1734_v31, %v712_v48  ;;  %v2496_v31 = vld [vmem:[#allocation12 + $0xb0] sm:$0xff]  ;;  %v2514_v46 = vld [vmem:[#allocation12 + $0x60] sm:$0xff]  ;;  %v2516_v48 = vld [vmem:[#allocation12 + $0x68] sm:$0xff] }
 0x24a   :  { %v721_v53 = vsel %vm718_vm3, %v720_v5, %v716_v50  ;;  %997 = vmatpush.msra.mxu0 %v2496_v31  ;;  %v2518_v5 = vld [vmem:[#allocation12 + $0x70] sm:$0xff]  ;;  %980 = vmatpush.msrb.mxu3 %v2514_v46 }
 0x24b   :  { %v734_v54 = vmul.f32 %v1736_v41, %v733_v10  ;;  %v747_v56 = vmul.f32 %v746_v15, %v721_v53  ;;  %v2523_v10 = vld [vmem:[#allocation12 + $0x48] sm:$0xff]  ;;  %v2525_v50 = vld [vmem:[#allocation12 + $0x50] sm:$0xff]  ;;  %v2527_v15 = vld [vmem:[#allocation12 + $0x58] sm:$0xff]  ;;  %1144 = vmatpush.msra.mxu2 %v2514_v46 }
 0x24c   :  { %998 = vmatpush.msra.mxu0 %v2502_v39  ;;  %981 = vmatpush.msrb.mxu3 %v2523_v10  ;;  %v2534_v53 = vld [vmem:[#allocation12 + $0x38] sm:$0xff] }
 0x24d   :  { %v735_v58 = vadd.f32 %v1736_v41, %v734_v54  ;;  %v750_v59 = vadd.f32 %v748_v51, %v747_v56  ;;  %v2532_v51 = vld [vmem:[#allocation12 + $0x30] sm:$0xff]  ;;  %v2536_v54 = vld [vmem:[#allocation12 + $0x40] sm:$0xff]  ;;  %v2539_v56 = vld [vmem:[#allocation12 + $0x18] sm:$0xff]  ;;  %1145 = vmatpush.msra.mxu2 %v2523_v10 }
 0x24e   :  { %982 = vmatpush.msrb.mxu3 %v2532_v51 }
 0x24f   :  { %v739_v62 = vsel %vm738_vm6, %v1736_v41, %v735_v58  ;;  %1737 = vtanh.f32 %v750_v59  ;;  %v2508_v41 = vld [vmem:[#allocation12 + $0x80] sm:$0xff]  ;;  %1146 = vmatpush.msra.mxu2 %v2532_v51 }
 0x250   :  { %v744_v63 = vsel %vm741_vm7, %v743_v61, %v739_v62  ;;  %999 = vmatpush.msra.mxu0 %v2508_v41  ;;  %v2546_v61 = vld [vmem:[#allocation12 + $0x28] sm:$0xff]  ;;  %983 = vmatpush.msrb.mxu3 %v2539_v56 }
 0x251   :  { %v752_v1 = vsub.f32 1.0, %v744_v63  ;;  %v754_v4 = vmul.f32 %v744_v63, %v2365_v35  ;;  %v2470_v35 = vld [vmem:[#allocation12 + $0x118] sm:$0xff]  ;;  %v2551_v63 = vld [vmem:[#allocation12] sm:$0xff]  ;;  %1147 = vmatpush.msra.mxu2 %v2539_v56 }
 0x252   :  { %1013 = vmatpush.msra.mxu1 %v2470_v35  ;;  %1000 = vmatpush.msra.mxu0 %v2516_v48 }
 0x253   :  { %984 = vmatpush.msrb.mxu3 %v2551_v63  ;;  %1148 = vmatpush.msra.mxu2 %v2551_v63 }
 0x254   :  { %1014 = vmatpush.msra.mxu1 %v2476_v24  ;;  %1001 = vmatpush.msra.mxu0 %v2525_v50 }
 0x255   :  { %v1738_v2 = vpop.eup %1737  ;;  %1153 = vmatpush.msra.mxu3 %v2444_v8 }
 0x256   :  { %v753_v3 = vmul.f32 %v1738_v2, %v752_v1  ;;  %1015 = vmatpush.msra.mxu1 %v2484_v49  ;;  %1002 = vmatpush.msra.mxu0 %v2534_v53  ;;  %v2553_v1 = vld [vmem:[#allocation12 + $0x8] sm:$0xff]  ;;  %v2558_v2 = vld [vmem:[#allocation12 + $0x10] sm:$0xff] }
 0x257   :  { %1154 = vmatpush.msra.mxu3 %v2450_v13 }
 0x258   :  { %v2438_v7 = vadd.f32 %v754_v4, %v753_v3  ;;  %1016 = vmatpush.msra.mxu1 %v2491_v19  ;;  %1003 = vmatpush.msra.mxu0 %v2541_v57 }
 0x259   :  { %1155 = vmatpush.msra.mxu3 %v2456_v22 }
 0x25a   :  { %756 = vst [vmem:[#allocation4 + $0x2] sm:$0x1] %v2438_v7  ;;  %821 = vmatmul.f32.vlgmr.msrb.gmra.mxu0 %v2438_v7  ;;  %841 = vmatmul.f32.vlgmr.msrb.gmra.mxu1 %v2438_v7 }
 0x25b   :  { %861 = vmatmul.f32.vlgmr.msrb.gmra.mxu2 %v2438_v7  ;;  %1017 = vmatpush.msra.mxu1 %v2498_v34 }
 0x25c   :  { %1004 = vmatpush.msra.mxu0 %v2553_v1  ;;  %1317 = vmatpush.msrb.mxu2 %v2444_v8 }
 0x25d   :  { %1018 = vmatpush.msra.mxu1 %v2504_v0  ;;  %1156 = vmatpush.msra.mxu3 %v2462_v27 }
 0x25e   :  { %1173 = vmatpush.msrb.mxu0 %v2446_v9  ;;  %1318 = vmatpush.msrb.mxu2 %v2450_v13 }
 0x25f   :  { %1019 = vmatpush.msra.mxu1 %v2510_v44  ;;  %1157 = vmatpush.msra.mxu3 %v2468_v33 }
 0x260   :  { %1174 = vmatpush.msrb.mxu0 %v2452_v18  ;;  %1319 = vmatpush.msrb.mxu2 %v2456_v22 }
 0x261   :  { %1020 = vmatpush.msra.mxu1 %v2518_v5  ;;  %1158 = vmatpush.msra.mxu3 %v2474_v20 }
 0x262   :  { %1175 = vmatpush.msrb.mxu0 %v2458_v25  ;;  %1320 = vmatpush.msrb.mxu2 %v2462_v27 }
 0x263   :  { %1021 = vmatpush.msra.mxu1 %v2527_v15  ;;  %1159 = vmatpush.msra.mxu3 %v2482_v38 }
 0x264   :  { %1176 = vmatpush.msrb.mxu0 %v2464_v30  ;;  %1321 = vmatpush.msrb.mxu2 %v2468_v33 }
 0x265   :  { %1022 = vmatpush.msra.mxu1 %v2536_v54  ;;  %1160 = vmatpush.msra.mxu3 %v2489_v17 }
 0x266   :  { %1177 = vmatpush.msrb.mxu0 %v2470_v35  ;;  %1322 = vmatpush.msrb.mxu2 %v2474_v20 }
 0x267   :  { %1023 = vmatpush.msra.mxu1 %v2546_v61  ;;  %1161 = vmatpush.msra.mxu3 %v2496_v31 }
 0x268   :  { %1178 = vmatpush.msrb.mxu0 %v2476_v24  ;;  %1323 = vmatpush.msrb.mxu2 %v2482_v38 }
 0x269   :  { %1024 = vmatpush.msra.mxu1 %v2558_v2  ;;  %1162 = vmatpush.msra.mxu3 %v2502_v39 }
 0x26a   :  { %1179 = vmatpush.msrb.mxu0 %v2484_v49  ;;  %1324 = vmatpush.msrb.mxu2 %v2489_v17 }
 0x26b   :  { %1297 = vmatpush.msrb.mxu1 %v2371_v37  ;;  %1163 = vmatpush.msra.mxu3 %v2508_v41 }
 0x26c   :  { %1180 = vmatpush.msrb.mxu0 %v2491_v19  ;;  %1325 = vmatpush.msrb.mxu2 %v2496_v31 }
 0x26d   :  { %1298 = vmatpush.msrb.mxu1 %v2375_v40  ;;  %1164 = vmatpush.msra.mxu3 %v2516_v48 }
 0x26e   :  { %1181 = vmatpush.msrb.mxu0 %v2498_v34  ;;  %1326 = vmatpush.msrb.mxu2 %v2502_v39 }
 0x26f   :  { %1299 = vmatpush.msrb.mxu1 %v2380_v43  ;;  %1165 = vmatpush.msra.mxu3 %v2525_v50 }
 0x270   :  { %1182 = vmatpush.msrb.mxu0 %v2504_v0  ;;  %1327 = vmatpush.msrb.mxu2 %v2508_v41 }
 0x271   :  { %1300 = vmatpush.msrb.mxu1 %v2385_v45  ;;  %1166 = vmatpush.msra.mxu3 %v2534_v53 }
 0x272   :  { %1183 = vmatpush.msrb.mxu0 %v2510_v44  ;;  %1328 = vmatpush.msrb.mxu2 %v2516_v48 }
 0x273   :  { %1301 = vmatpush.msrb.mxu1 %v2390_v47  ;;  %v912_v47 = vrot.slane %v2478_v28, 2  ;;  %1167 = vmatpush.msra.mxu3 %v2541_v57 }
 0x274   :  { %1184 = vmatpush.msrb.mxu0 %v2518_v5  ;;  %1329 = vmatpush.msrb.mxu2 %v2525_v50 }
 0x275   :  { %1302 = vmatpush.msrb.mxu1 %v2395_v11  ;;  %1168 = vmatpush.msra.mxu3 %v2553_v1 }
 0x276   :  { %1185 = vmatpush.msrb.mxu0 %v2527_v15  ;;  %1330 = vmatpush.msrb.mxu2 %v2534_v53 }
 0x277   :  { %1303 = vmatpush.msrb.mxu1 %v2400_v14 }
 0x278   :  { %1186 = vmatpush.msrb.mxu0 %v2536_v54  ;;  %1331 = vmatpush.msrb.mxu2 %v2541_v57 }
 0x279   :  { %1304 = vmatpush.msrb.mxu1 %v2405_v16 }
 0x27a   :  { %1187 = vmatpush.msrb.mxu0 %v2546_v61  ;;  %1332 = vmatpush.msrb.mxu2 %v2553_v1 }
 0x27b   :  { %1305 = vmatpush.msrb.mxu1 %v2413_v32 }
 0x27c   :  { %1188 = vmatpush.msrb.mxu0 %v2558_v2 }
 0x27d   :  { %1306 = vmatpush.msrb.mxu1 %v2418_v42 }
 0x27f   :  { %1307 = vmatpush.msrb.mxu1 %v2424_v52 }
 0x281   :  { %1308 = vmatpush.msrb.mxu1 %v2514_v46 }
 0x283   :  { %1309 = vmatpush.msrb.mxu1 %v2523_v10 }
 0x285   :  { %1310 = vmatpush.msrb.mxu1 %v2532_v51 }
 0x287   :  { %1311 = vmatpush.msrb.mxu1 %v2539_v56 }
 0x289   :  { %1312 = vmatpush.msrb.mxu1 %v2551_v63 }
 0x2d7   :  { %v822_v21 = vpop.f32.mrf.mxu0  ;;  %v842_v23 = vpop.f32.mrf.mxu1 }
 0x2d8   :  { %v867_v26 = vadd.f32 %v2478_v28, %v822_v21  ;;  %v890_v29 = vadd.f32 %v888_v12, %v842_v23 }
 0x2da   :  { %v1687_v36 = vmul.f32 -1.442695, %v867_v26  ;;  %v1688_v60 = vmul.f32 -1.442695, %v890_v29 }
 0x2dc   :  { %1739 = vpow2.f32 %v1687_v36 }
 0x2dd   :  { %1741 = vpow2.f32 %v1688_v60 }
 0x2de   :  { %v862_v60 = vpop.f32.mrf.mxu2 }
 0x2e2   :  { %v1740_v55 = vpop.eup %1739 }
 0x2e3   :  { %v1742_v58 = vpop.eup %1741  ;;  %v871_v59 = vadd.f32 1.0, %v1740_v55 }
 0x2e4   :  { %v2548_v62 = vadd.f32 1.0, %v1742_v58  ;;  %v910_v58 = vadd.f32 %v862_v60, %v2337_v6 }
 0x2e5   :  { %1743 = vrcp.f32 %v871_v59  ;;  %v883_v26 = vand.u32 2147483648, %v871_v59  ;;  %v881_v40 = vand.u32 2147483647, %v871_v59  ;;  %vm877_vm9 = vweird.f32 %v871_v59 }
 0x2e6   :  { %1745 = vrcp.f32 %v2548_v62  ;;  %vm900_vm13 = vweird.f32 %v2548_v62  ;;  %v904_v11 = vand.u32 2147483647, %v2548_v62 }
 0x2e7   :  { %v884_v55 = vor.u32 1.1754944e-38, %v883_v26  ;;  %vm882_vm11 = vcmp.eq.f32.partialorder %v881_v40, 8.507059e+37 }
 0x2e8   :  { %vm905_vm15 = vcmp.eq.f32.partialorder %v904_v11, 8.507059e+37 }
 0x2eb   :  { %v1744_v3 = vpop.eup %1743 }
 0x2ec   :  { %v2573_v4 = vpop.eup %1745  ;;  %v873_v12 = vmul.f32 %v1744_v3, %v871_v59  ;;  %vm878_vm8 = vweird.f32 %v1744_v3 }
 0x2ed   :  { %v896_v21 = vmul.f32 %v2573_v4, %v2548_v62  ;;  %vm879_vm10 = vmor %vm877_vm9, %vm878_vm8  ;;  %vm901_vm12 = vweird.f32 %v2573_v4 }
 0x2ee   :  { %v874_v37 = vsub.f32 1.0, %v873_v12  ;;  %vm902_vm14 = vmor %vm900_vm13, %vm901_vm12 }
 0x2ef   :  { %v897_v23 = vsub.f32 1.0, %v896_v21 }
 0x2f0   :  { %v875_v29 = vmul.f32 %v1744_v3, %v874_v37 }
 0x2f1   :  { %v898_v36 = vmul.f32 %v2573_v4, %v897_v23 }
 0x2f2   :  { %v876_v43 = vadd.f32 %v1744_v3, %v875_v29 }
 0x2f3   :  { %v899_v59 = vadd.f32 %v2573_v4, %v898_v36 }
 0x2f4   :  { %v880_v45 = vsel %vm879_vm10, %v1744_v3, %v876_v43  ;;  %v906_v3 = vand.u32 2147483648, %v2548_v62 }
 0x2f5   :  { %v885_v12 = vsel %vm882_vm11, %v884_v55, %v880_v45  ;;  %v903_v28 = vsel %vm902_vm14, %v2573_v4, %v899_v59 }
 0x2f6   :  { %v911_v21 = vmul.f32 %v910_v58, %v885_v12  ;;  %v907_v14 = vor.u32 1.1754944e-38, %v906_v3 }
 0x2f8   :  { %v914_v37 = vadd.f32 %v912_v47, %v911_v21  ;;  %v908_v62 = vsel %vm905_vm15, %v907_v14, %v903_v28 }
 0x2f9   :  { %v916_v16 = vsub.f32 1.0, %v908_v62  ;;  %v918_v42 = vmul.f32 %v908_v62, %v2438_v7  ;;  %v1030_v7 = vld [vmem:[#allocation3 + $0x4] ss:$8 sm:$0x7] }
 0x2fa   :  { %1747 = vtanh.f32 %v914_v37  ;;  %v1076_v3 = vrot.slane %v1030_v7, 2 }
 0x300   :  { %v1748_v32 = vpop.eup %1747 }
 0x301   :  { %v917_v4 = vmul.f32 %v1748_v32, %v916_v16 }
 0x303   :  { %v2633_v52 = vadd.f32 %v918_v42, %v917_v4 }
 0x305   :  { %920 = vst [vmem:[#allocation4 + $0x3] sm:$0x1] %v2633_v52  ;;  %985 = vmatmul.f32.vlgmr.msrb.gmra.mxu3 %v2633_v52  ;;  %1005 = vmatmul.f32.vlgmr.msra.gmra.mxu0 %v2633_v52 }
 0x306   :  { %1025 = vmatmul.f32.vlgmr.msra.gmra.mxu1 %v2633_v52  ;;  %1337 = vmatpush.msrb.mxu3 %v2446_v9 }
 0x307   :  { %1481 = vmatpush.msra.mxu1 %v2444_v8  ;;  %v1052_v8 = vrot.slane %v1030_v7, 1 }
 0x308   :  { %1338 = vmatpush.msrb.mxu3 %v2452_v18 }
 0x309   :  { %1482 = vmatpush.msra.mxu1 %v2450_v13 }
 0x30a   :  { %1339 = vmatpush.msrb.mxu3 %v2458_v25 }
 0x30b   :  { %1483 = vmatpush.msra.mxu1 %v2456_v22 }
 0x30c   :  { %1340 = vmatpush.msrb.mxu3 %v2464_v30 }
 0x30d   :  { %1484 = vmatpush.msra.mxu1 %v2462_v27 }
 0x30e   :  { %1341 = vmatpush.msrb.mxu3 %v2470_v35 }
 0x30f   :  { %1485 = vmatpush.msra.mxu1 %v2468_v33 }
 0x310   :  { %1342 = vmatpush.msrb.mxu3 %v2476_v24 }
 0x311   :  { %1486 = vmatpush.msra.mxu1 %v2474_v20 }
 0x312   :  { %1343 = vmatpush.msrb.mxu3 %v2484_v49 }
 0x313   :  { %1487 = vmatpush.msra.mxu1 %v2482_v38 }
 0x314   :  { %1344 = vmatpush.msrb.mxu3 %v2491_v19 }
 0x315   :  { %1488 = vmatpush.msra.mxu1 %v2489_v17 }
 0x316   :  { %1345 = vmatpush.msrb.mxu3 %v2498_v34 }
 0x317   :  { %1489 = vmatpush.msra.mxu1 %v2496_v31 }
 0x318   :  { %1346 = vmatpush.msrb.mxu3 %v2504_v0 }
 0x319   :  { %1490 = vmatpush.msra.mxu1 %v2502_v39 }
 0x31a   :  { %1347 = vmatpush.msrb.mxu3 %v2510_v44 }
 0x31b   :  { %1491 = vmatpush.msra.mxu1 %v2508_v41 }
 0x31c   :  { %1348 = vmatpush.msrb.mxu3 %v2518_v5 }
 0x31d   :  { %1492 = vmatpush.msra.mxu1 %v2516_v48 }
 0x31e   :  { %1349 = vmatpush.msrb.mxu3 %v2527_v15 }
 0x31f   :  { %1493 = vmatpush.msra.mxu1 %v2525_v50 }
 0x320   :  { %1350 = vmatpush.msrb.mxu3 %v2536_v54 }
 0x321   :  { %1494 = vmatpush.msra.mxu1 %v2534_v53 }
 0x322   :  { %1351 = vmatpush.msrb.mxu3 %v2546_v61 }
 0x323   :  { %1495 = vmatpush.msra.mxu1 %v2541_v57 }
 0x324   :  { %1352 = vmatpush.msrb.mxu3 %v2558_v2 }
 0x325   :  { %1496 = vmatpush.msra.mxu1 %v2553_v1 }
 0x382   :  { %v1006_v13 = vpop.f32.mrf.mxu0 }
 0x383   :  { %v1054_v22 = vadd.f32 %v1052_v8, %v1006_v13  ;;  %v1026_v60 = vpop.f32.mrf.mxu1 }
 0x384   :  { %v1074_v45 = vadd.f32 %v1026_v60, %v2337_v6 }
 0x385   :  { %v1690_v27 = vmul.f32 -1.442695, %v1054_v22 }
 0x387   :  { %1749 = vpow2.f32 %v1690_v27 }
 0x388   :  { %v986_v33 = vpop.f32.mrf.mxu3 }
 0x389   :  { %v1031_v20 = vadd.f32 %v1030_v7, %v986_v33 }
 0x38b   :  { %v1689_v38 = vmul.f32 -1.442695, %v1031_v20 }
 0x38d   :  { %v1750_v17 = vpop.eup %1749  ;;  %1751 = vpow2.f32 %v1689_v38 }
 0x38e   :  { %v1058_v31 = vadd.f32 1.0, %v1750_v17  ;;  %v2710_v17 = vld [vmem:[%s2755_s6] sm:$0x1] }
 0x390   :  { %1753 = vrcp.f32 %v1058_v31  ;;  %v1070_v47 = vand.u32 2147483648, %v1058_v31  ;;  %vm1064_vm5 = vweird.f32 %v1058_v31  ;;  %v1068_v11 = vand.u32 2147483647, %v1058_v31 }
 0x392   :  { %v1071_v14 = vor.u32 1.1754944e-38, %v1070_v47  ;;  %vm1069_vm7 = vcmp.eq.f32.partialorder %v1068_v11, 8.507059e+37  ;;  %v1449_v47 = vld [vmem:[#allocation12 + $0x120] sm:$0xff]  ;;  %v1440_v11 = vld [vmem:[#allocation12 + $0xd8] sm:$0xff] }
 0x393   :  { %v1752_v39 = vpop.eup %1751 }
 0x394   :  { %v1035_v41 = vadd.f32 1.0, %v1752_v39 }
 0x396   :  { %1755 = vrcp.f32 %v1035_v41  ;;  %v1754_v48 = vpop.eup %1753  ;;  %v1047_v26 = vand.u32 2147483648, %v1035_v41  ;;  %v1045_v40 = vand.u32 2147483647, %v1035_v41  ;;  %vm1041_vm1 = vweird.f32 %v1035_v41 }
 0x397   :  { %v1060_v50 = vmul.f32 %v1754_v48, %v1058_v31  ;;  %vm1065_vm4 = vweird.f32 %v1754_v48 }
 0x398   :  { %v1048_v55 = vor.u32 1.1754944e-38, %v1047_v26  ;;  %vm1046_vm3 = vcmp.eq.f32.partialorder %v1045_v40, 8.507059e+37  ;;  %vm1066_vm6 = vmor %vm1064_vm5, %vm1065_vm4 }
 0x399   :  { %v1061_v1 = vsub.f32 1.0, %v1060_v50 }
 0x39b   :  { %v1062_v36 = vmul.f32 %v1754_v48, %v1061_v1 }
 0x39c   :  { %v1756_v53 = vpop.eup %1755 }
 0x39d   :  { %v1037_v57 = vmul.f32 %v1756_v53, %v1035_v41  ;;  %vm1042_vm0 = vweird.f32 %v1756_v53  ;;  %v1063_v59 = vadd.f32 %v1754_v48, %v1062_v36 }
 0x39e   :  { %vm1043_vm2 = vmor %vm1041_vm1, %vm1042_vm0 }
 0x39f   :  { %v1038_v23 = vsub.f32 1.0, %v1037_v57  ;;  %v1067_v28 = vsel %vm1066_vm6, %v1754_v48, %v1063_v59  ;;  %v1455_v59 = vld [vmem:[#allocation12 + $0x150] sm:$0xff] }
 0x3a0   :  { %v1072_v62 = vsel %vm1069_vm7, %v1071_v14, %v1067_v28  ;;  %v1358_v14 = vld [vmem:[#allocation3 + $0x6] ss:$8 sm:$0x7] }
 0x3a1   :  { %v1039_v29 = vmul.f32 %v1756_v53, %v1038_v23  ;;  %v1080_v16 = vsub.f32 1.0, %v1072_v62  ;;  %v1082_v4 = vmul.f32 %v1072_v62, %v2633_v52 }
 0x3a3   :  { %v1040_v43 = vadd.f32 %v1756_v53, %v1039_v29 }
 0x3a5   :  { %v1044_v58 = vsel %vm1043_vm2, %v1756_v53, %v1040_v43 }
 0x3a6   :  { %v1049_v12 = vsel %vm1046_vm3, %v1048_v55, %v1044_v58  ;;  %v1458_v58 = vld [vmem:[#allocation12 + $0x168] sm:$0xff] }
 0x3a7   :  { %v1075_v21 = vmul.f32 %v1074_v45, %v1049_v12  ;;  %1461 = vmatpush.msra.mxu0 %v1458_v58  ;;  %v1452_v12 = vld [vmem:[#allocation12 + $0x138] sm:$0xff] }
 0x3a8   :  { %v1590_v58 = vld [vmem:[#allocation13 + $0x58] sm:$0xff] }
 0x3a9   :  { %v1078_v37 = vadd.f32 %v1076_v3, %v1075_v21  ;;  %1462 = vmatpush.msra.mxu0 %v1455_v59  ;;  %v1446_v3 = vld [vmem:[#allocation12 + $0x108] sm:$0xff]  ;;  %v1443_v21 = vld [vmem:[#allocation12 + $0xf0] sm:$0xff] }
 0x3ab   :  { %1757 = vtanh.f32 %v1078_v37  ;;  %1463 = vmatpush.msra.mxu0 %v1452_v12  ;;  %v1437_v37 = vld [vmem:[#allocation12 + $0xc0] sm:$0xff] }
 0x3ad   :  { %1464 = vmatpush.msra.mxu0 %v1449_v47  ;;  %v1589_v47 = vld [vmem:[#allocation13 + $0x50] sm:$0xff] }
 0x3af   :  { %1465 = vmatpush.msra.mxu0 %v1446_v3  ;;  %v1588_v3 = vld [vmem:[#allocation13 + $0x48] sm:$0xff] }
 0x3b1   :  { %v1758_v32 = vpop.eup %1757  ;;  %1466 = vmatpush.msra.mxu0 %v1443_v21  ;;  %v1587_v21 = vld [vmem:[#allocation13 + $0x40] sm:$0xff] }
 0x3b2   :  { %v1081_v6 = vmul.f32 %v1758_v32, %v1080_v16  ;;  %v1434_v16 = vld [vmem:[#allocation12 + $0xa8] sm:$0xff] }
 0x3b3   :  { %1467 = vmatpush.msra.mxu0 %v1440_v11  ;;  %v1586_v11 = vld [vmem:[#allocation13 + $0x38] sm:$0xff] }
 0x3b4   :  { %v2685_v42 = vadd.f32 %v1082_v4, %v1081_v6  ;;  %v1431_v6 = vld [vmem:[#allocation12 + $0x90] sm:$0xff]  ;;  %v1380_v4 = vrot.slane %v1358_v14, 1 }
 0x3b5   :  { %1468 = vmatpush.msra.mxu0 %v1437_v37 }
 0x3b6   :  { %1084 = vst [vmem:[#allocation4 + $0x4] sm:$0x1] %v2685_v42  ;;  %1149 = vmatmul.f32.vlgmr.msra.gmra.mxu2 %v2685_v42  ;;  %1169 = vmatmul.f32.vlgmr.msra.gmra.mxu3 %v2685_v42 }
 0x3b7   :  { %1189 = vmatmul.f32.vlgmr.msrb.gmra.mxu0 %v2685_v42  ;;  %1501 = vmatpush.msra.mxu2 %v2446_v9  ;;  %v1194_v9 = vld [vmem:[#allocation3 + $0x5] ss:$8 sm:$0x7] }
 0x3b8   :  { %v1240_v53 = vrot.slane %v1194_v9, 2  ;;  %1469 = vmatpush.msra.mxu0 %v1434_v16 }
 0x3b9   :  { %1502 = vmatpush.msra.mxu2 %v2452_v18  ;;  %v1216_v18 = vrot.slane %v1194_v9, 1 }
 0x3ba   :  { %1470 = vmatpush.msra.mxu0 %v1431_v6  ;;  %v1583_v6 = vld [vmem:[#allocation13 + $0x20] sm:$0xff] }
 0x3bb   :  { %1503 = vmatpush.msra.mxu2 %v2458_v25 }
 0x3bd   :  { %1504 = vmatpush.msra.mxu2 %v2464_v30 }
 0x3bf   :  { %1505 = vmatpush.msra.mxu2 %v2470_v35 }
 0x3c1   :  { %1506 = vmatpush.msra.mxu2 %v2476_v24 }
 0x3c3   :  { %1507 = vmatpush.msra.mxu2 %v2484_v49 }
 0x3c5   :  { %1508 = vmatpush.msra.mxu2 %v2491_v19 }
 0x3c7   :  { %1509 = vmatpush.msra.mxu2 %v2498_v34 }
 0x3c9   :  { %1510 = vmatpush.msra.mxu2 %v2504_v0 }
 0x3cb   :  { %1511 = vmatpush.msra.mxu2 %v2510_v44 }
 0x3cd   :  { %1512 = vmatpush.msra.mxu2 %v2518_v5 }
 0x3cf   :  { %1513 = vmatpush.msra.mxu2 %v2527_v15 }
 0x3d1   :  { %1514 = vmatpush.msra.mxu2 %v2536_v54 }
 0x3d3   :  { %1515 = vmatpush.msra.mxu2 %v2546_v61 }
 0x3d5   :  { %1516 = vmatpush.msra.mxu2 %v2558_v2 }
 0x434   :  { %v1190_v27 = vpop.f32.mrf.mxu0 }
 0x435   :  { %v1238_v31 = vadd.f32 %v2710_v17, %v1190_v27 }
 0x439   :  { %v1150_v25 = vpop.f32.mrf.mxu2  ;;  %v1170_v30 = vpop.f32.mrf.mxu3 }
 0x43a   :  { %v1195_v35 = vadd.f32 %v1194_v9, %v1150_v25  ;;  %v1218_v24 = vadd.f32 %v1216_v18, %v1170_v30 }
 0x43c   :  { %v1691_v49 = vmul.f32 -1.442695, %v1195_v35  ;;  %v1692_v19 = vmul.f32 -1.442695, %v1218_v24 }
 0x43e   :  { %1759 = vpow2.f32 %v1691_v49 }
 0x43f   :  { %1761 = vpow2.f32 %v1692_v19 }
 0x444   :  { %v1760_v34 = vpop.eup %1759 }
 0x445   :  { %v1762_v0 = vpop.eup %1761  ;;  %v1199_v44 = vadd.f32 1.0, %v1760_v34 }
 0x446   :  { %v1222_v5 = vadd.f32 1.0, %v1762_v0 }
 0x447   :  { %1763 = vrcp.f32 %v1199_v44  ;;  %v1211_v7 = vand.u32 2147483648, %v1199_v44  ;;  %v1209_v22 = vand.u32 2147483647, %v1199_v44  ;;  %vm1205_vm9 = vweird.f32 %v1199_v44 }
 0x448   :  { %1765 = vrcp.f32 %v1222_v5  ;;  %v1234_v57 = vand.u32 2147483648, %v1222_v5  ;;  %vm1228_vm13 = vweird.f32 %v1222_v5  ;;  %v1232_v1 = vand.u32 2147483647, %v1222_v5 }
 0x449   :  { %v1212_v38 = vor.u32 1.1754944e-38, %v1211_v7  ;;  %vm1210_vm11 = vcmp.eq.f32.partialorder %v1209_v22, 8.507059e+37 }
 0x44a   :  { %v1235_v29 = vor.u32 1.1754944e-38, %v1234_v57  ;;  %vm1233_vm15 = vcmp.eq.f32.partialorder %v1232_v1, 8.507059e+37  ;;  %v1594_v1 = vld [vmem:[#allocation13 + $0x78] sm:$0xff] }
 0x44b   :  { %1599 = vmatpush.msra.mxu3 %v1594_v1 }
 0x44d   :  { %v1764_v15 = vpop.eup %1763 }
 0x44e   :  { %v1766_v54 = vpop.eup %1765  ;;  %v1201_v61 = vmul.f32 %v1764_v15, %v1199_v44  ;;  %vm1206_vm8 = vweird.f32 %v1764_v15 }
 0x44f   :  { %v1224_v2 = vmul.f32 %v1766_v54, %v1222_v5  ;;  %vm1207_vm10 = vmor %vm1205_vm9, %vm1206_vm8  ;;  %vm1229_vm12 = vweird.f32 %v1766_v54 }
 0x450   :  { %v1202_v52 = vsub.f32 1.0, %v1201_v61  ;;  %vm1230_vm14 = vmor %vm1228_vm13, %vm1229_vm12 }
 0x451   :  { %v1225_v8 = vsub.f32 1.0, %v1224_v2 }
 0x452   :  { %v1203_v13 = vmul.f32 %v1764_v15, %v1202_v52  ;;  %v1404_v52 = vrot.slane %v1358_v14, 2 }
 0x453   :  { %v1226_v33 = vmul.f32 %v1766_v54, %v1225_v8 }
 0x454   :  { %v1204_v20 = vadd.f32 %v1764_v15, %v1203_v13 }
 0x455   :  { %v1227_v48 = vadd.f32 %v1766_v54, %v1226_v33 }
 0x456   :  { %v1208_v39 = vsel %vm1207_vm10, %v1764_v15, %v1204_v20 }
 0x457   :  { %v1213_v41 = vsel %vm1210_vm11, %v1212_v38, %v1208_v39  ;;  %v1231_v26 = vsel %vm1230_vm14, %v1766_v54, %v1227_v48 }
 0x458   :  { %v1239_v50 = vmul.f32 %v1238_v31, %v1213_v41  ;;  %v1236_v40 = vsel %vm1233_vm15, %v1235_v29, %v1231_v26  ;;  %v2733_v26 = vld [vmem:[#allocation3 + $0x7] ss:$8 sm:$0x7] }
 0x459   :  { %v1244_v36 = vsub.f32 1.0, %v1236_v40  ;;  %v1246_v55 = vmul.f32 %v1236_v40, %v2685_v42  ;;  %v1428_v42 = vld [vmem:[#allocation12 + $0x78] sm:$0xff]  ;;  %v1592_v29 = vld [vmem:[#allocation13 + $0x68] sm:$0xff]  ;;  %v1544_v40 = vrot.slane %v2733_v26, 1 }
 0x45a   :  { %v1242_v23 = vadd.f32 %v1240_v53, %v1239_v50  ;;  %1471 = vmatpush.msra.mxu0 %v1428_v42  ;;  %v1581_v42 = vld [vmem:[#allocation13 + $0x10] sm:$0xff] }
 0x45c   :  { %1767 = vtanh.f32 %v1242_v23  ;;  %1472 = vmatpush.msra.mxu0 %v2514_v46  ;;  %v1593_v23 = vld [vmem:[#allocation13 + $0x70] sm:$0xff] }
 0x45d   :  { %1600 = vmatpush.msra.mxu3 %v1593_v23 }
 0x45e   :  { %1473 = vmatpush.msra.mxu0 %v2523_v10 }
 0x45f   :  { %1601 = vmatpush.msra.mxu3 %v1592_v29 }
 0x460   :  { %1474 = vmatpush.msra.mxu0 %v2532_v51 }
 0x462   :  { %v1768_v60 = vpop.eup %1767  ;;  %1475 = vmatpush.msra.mxu0 %v2539_v56 }
 0x463   :  { %v1245_v43 = vmul.f32 %v1768_v60, %v1244_v36  ;;  %v1591_v36 = vld [vmem:[#allocation13 + $0x60] sm:$0xff] }
 0x464   :  { %1476 = vmatpush.msra.mxu0 %v2551_v63  ;;  %1602 = vmatpush.msra.mxu3 %v1591_v36 }
 0x465   :  { %v2714_v45 = vadd.f32 %v1246_v55, %v1245_v43 }
 0x466   :  { %1603 = vmatpush.msra.mxu3 %v1590_v58 }
 0x467   :  { %1248 = vst [vmem:[#allocation4 + $0x5] sm:$0x1] %v2714_v45  ;;  %1313 = vmatmul.f32.vlgmr.msrb.gmra.mxu1 %v2714_v45  ;;  %1333 = vmatmul.f32.vlgmr.msrb.gmra.mxu2 %v2714_v45 }
 0x468   :  { %1353 = vmatmul.f32.vlgmr.msrb.gmra.mxu3 %v2714_v45 }
 0x469   :  { %1604 = vmatpush.msra.mxu3 %v1589_v47 }
 0x46b   :  { %1605 = vmatpush.msra.mxu3 %v1588_v3 }
 0x46d   :  { %1606 = vmatpush.msra.mxu3 %v1587_v21 }
 0x46f   :  { %1607 = vmatpush.msra.mxu3 %v1586_v11 }
 0x4e4   :  { %v1314_v28 = vpop.f32.mrf.mxu1 }
 0x4e5   :  { %v1359_v62 = vadd.f32 %v1358_v14, %v1314_v28  ;;  %v1585_v28 = vld [vmem:[#allocation13 + $0x30] sm:$0xff] }
 0x4e6   :  { %1608 = vmatpush.msra.mxu3 %v1585_v28 }
 0x4e7   :  { %v1693_v32 = vmul.f32 -1.442695, %v1359_v62 }
 0x4e9   :  { %1769 = vpow2.f32 %v1693_v32  ;;  %v1584_v32 = vld [vmem:[#allocation13 + $0x28] sm:$0xff] }
 0x4ea   :  { %v1334_v9 = vpop.f32.mrf.mxu2  ;;  %1609 = vmatpush.msra.mxu3 %v1584_v32 }
 0x4eb   :  { %v1382_v18 = vadd.f32 %v1380_v4, %v1334_v9  ;;  %v1354_v15 = vpop.f32.mrf.mxu3  ;;  %v1582_v4 = vld [vmem:[#allocation13 + $0x18] sm:$0xff]  ;;  %v1580_v9 = vld [vmem:[#allocation13 + $0x8] sm:$0xff] }
 0x4ec   :  { %v1402_v63 = vadd.f32 %v2710_v17, %v1354_v15  ;;  %1610 = vmatpush.msra.mxu3 %v1583_v6 }
 0x4ed   :  { %v1694_v25 = vmul.f32 -1.442695, %v1382_v18 }
 0x4ee   :  { %1611 = vmatpush.msra.mxu3 %v1582_v4 }
 0x4ef   :  { %v1770_v30 = vpop.eup %1769  ;;  %1771 = vpow2.f32 %v1694_v25 }
 0x4f0   :  { %v1363_v35 = vadd.f32 1.0, %v1770_v30  ;;  %1612 = vmatpush.msra.mxu3 %v1581_v42 }
 0x4f2   :  { %1773 = vrcp.f32 %v1363_v35  ;;  %v1375_v46 = vand.u32 2147483648, %v1363_v35  ;;  %v1373_v10 = vand.u32 2147483647, %v1363_v35  ;;  %vm1369_vm1 = vweird.f32 %v1363_v35  ;;  %1613 = vmatpush.msra.mxu3 %v1580_v9 }
 0x4f4   :  { %v1376_v51 = vor.u32 1.1754944e-38, %v1375_v46  ;;  %vm1374_vm3 = vcmp.eq.f32.partialorder %v1373_v10, 8.507059e+37 }
 0x4f5   :  { %v1772_v24 = vpop.eup %1771 }
 0x4f6   :  { %v1386_v49 = vadd.f32 1.0, %v1772_v24 }
 0x4f8   :  { %v1774_v19 = vpop.eup %1773  ;;  %1775 = vrcp.f32 %v1386_v49  ;;  %v1398_v13 = vand.u32 2147483648, %v1386_v49  ;;  %v1396_v27 = vand.u32 2147483647, %v1386_v49  ;;  %vm1392_vm5 = vweird.f32 %v1386_v49 }
 0x4f9   :  { %v1365_v34 = vmul.f32 %v1774_v19, %v1363_v35  ;;  %vm1370_vm0 = vweird.f32 %v1774_v19  ;;  %v1579_v35 = vld [vmem:[#allocation13] sm:$0xff] }
 0x4fa   :  { %vm1371_vm2 = vmor %vm1369_vm1, %vm1370_vm0  ;;  %v1399_v38 = vor.u32 1.1754944e-38, %v1398_v13  ;;  %vm1397_vm7 = vcmp.eq.f32.partialorder %v1396_v27, 8.507059e+37  ;;  %1614 = vmatpush.msra.mxu3 %v1579_v35 }
 0x4fb   :  { %v1366_v0 = vsub.f32 1.0, %v1365_v34 }
 0x4fd   :  { %v1367_v44 = vmul.f32 %v1774_v19, %v1366_v0 }
 0x4fe   :  { %v1776_v5 = vpop.eup %1775 }
 0x4ff   :  { %v1388_v54 = vmul.f32 %v1776_v5, %v1386_v49  ;;  %v1368_v61 = vadd.f32 %v1774_v19, %v1367_v44  ;;  %vm1393_vm4 = vweird.f32 %v1776_v5 }
 0x500   :  { %vm1394_vm6 = vmor %vm1392_vm5, %vm1393_vm4 }
 0x501   :  { %v1389_v56 = vsub.f32 1.0, %v1388_v54  ;;  %v1372_v2 = vsel %vm1371_vm2, %v1774_v19, %v1368_v61 }
 0x502   :  { %v1377_v7 = vsel %vm1374_vm3, %v1376_v51, %v1372_v2  ;;  %v1568_v2 = vrot.slane %v2733_v26, 2 }
 0x503   :  { %v1390_v8 = vmul.f32 %v1776_v5, %v1389_v56  ;;  %v1403_v22 = vmul.f32 %v1402_v63, %v1377_v7 }
 0x505   :  { %v1391_v33 = vadd.f32 %v1776_v5, %v1390_v8  ;;  %v1406_v20 = vadd.f32 %v1404_v52, %v1403_v22 }
 0x507   :  { %v1395_v31 = vsel %vm1394_vm6, %v1776_v5, %v1391_v33  ;;  %1777 = vtanh.f32 %v1406_v20 }
 0x508   :  { %v1400_v39 = vsel %vm1397_vm7, %v1399_v38, %v1395_v31 }
 0x509   :  { %v1408_v41 = vsub.f32 1.0, %v1400_v39  ;;  %v1410_v53 = vmul.f32 %v1400_v39, %v2714_v45 }
 0x50d   :  { %v1778_v48 = vpop.eup %1777 }
 0x50e   :  { %v1409_v50 = vmul.f32 %v1778_v48, %v1408_v41  ;;  %v1708_v41 = vld [vmem:[%s2757_s8] ss:$0 sm:$0xff]  ;;  %s1972_s8 = smov [#allocation15]  }
 0x50f   :  { %s1635_s19 = sshll.u32 %s1972_s8, 4  ;;  %s1636_s19 = int_to_ptr.vmem [resolvable:$true] %s1635_s19 }
 0x510   :  { %v2727_v57 = vadd.f32 %v1410_v53, %v1409_v50 }
 0x512   :  { %1412 = vst [vmem:[#allocation4 + $0x6] sm:$0x1] %v2727_v57  ;;  %1477 = vmatmul.f32.vlgmr.msra.gmra.mxu0 %v2727_v57  ;;  %1497 = vmatmul.f32.vlgmr.msra.gmra.mxu1 %v2727_v57 }
 0x513   :  { %1517 = vmatmul.f32.vlgmr.msra.gmra.mxu2 %v2727_v57 }
 0x58f   :  { %v1478_v60 = vpop.f32.mrf.mxu0  ;;  %v1498_v43 = vpop.f32.mrf.mxu1 }
 0x590   :  { %v1523_v55 = vadd.f32 %v2733_v26, %v1478_v60  ;;  %v1546_v45 = vadd.f32 %v1544_v40, %v1498_v43 }
 0x592   :  { %v1695_v59 = vmul.f32 -1.442695, %v1523_v55  ;;  %v1696_v12 = vmul.f32 -1.442695, %v1546_v45 }
 0x594   :  { %1779 = vpow2.f32 %v1695_v59 }
 0x595   :  { %1781 = vpow2.f32 %v1696_v12 }
 0x596   :  { %v1518_v10 = vpop.f32.mrf.mxu2 }
 0x597   :  { %v1566_v61 = vadd.f32 %v2710_v17, %v1518_v10 }
 0x59a   :  { %v1780_v37 = vpop.eup %1779 }
 0x59b   :  { %v1782_v14 = vpop.eup %1781  ;;  %v1527_v62 = vadd.f32 1.0, %v1780_v37 }
 0x59c   :  { %v1550_v16 = vadd.f32 1.0, %v1782_v14 }
 0x59d   :  { %1783 = vrcp.f32 %v1527_v62  ;;  %v1539_v34 = vand.u32 2147483648, %v1527_v62  ;;  %v1537_v46 = vand.u32 2147483647, %v1527_v62  ;;  %vm1533_vm9 = vweird.f32 %v1527_v62 }
 0x59e   :  { %1785 = vrcp.f32 %v1550_v16  ;;  %v1562_v63 = vand.u32 2147483648, %v1550_v16  ;;  %vm1556_vm13 = vweird.f32 %v1550_v16  ;;  %v1560_v7 = vand.u32 2147483647, %v1550_v16 }
 0x59f   :  { %v1540_v15 = vor.u32 1.1754944e-38, %v1539_v34  ;;  %vm1538_vm11 = vcmp.eq.f32.partialorder %v1537_v46, 8.507059e+37 }
 0x5a0   :  { %v1563_v22 = vor.u32 1.1754944e-38, %v1562_v63  ;;  %vm1561_vm15 = vcmp.eq.f32.partialorder %v1560_v7, 8.507059e+37 }
 0x5a3   :  { %v1784_v18 = vpop.eup %1783 }
 0x5a4   :  { %v1786_v25 = vpop.eup %1785  ;;  %v1529_v30 = vmul.f32 %v1784_v18, %v1527_v62  ;;  %vm1534_vm8 = vweird.f32 %v1784_v18 }
 0x5a5   :  { %v1552_v24 = vmul.f32 %v1786_v25, %v1550_v16  ;;  %vm1535_vm10 = vmor %vm1533_vm9, %vm1534_vm8  ;;  %vm1557_vm12 = vweird.f32 %v1786_v25 }
 0x5a6   :  { %v1530_v49 = vsub.f32 1.0, %v1529_v30  ;;  %vm1558_vm14 = vmor %vm1556_vm13, %vm1557_vm12 }
 0x5a7   :  { %v1553_v19 = vsub.f32 1.0, %v1552_v24 }
 0x5a8   :  { %v1531_v0 = vmul.f32 %v1784_v18, %v1530_v49 }
 0x5a9   :  { %v1554_v44 = vmul.f32 %v1786_v25, %v1553_v19 }
 0x5aa   :  { %v1532_v5 = vadd.f32 %v1784_v18, %v1531_v0 }
 0x5ab   :  { %v1555_v51 = vadd.f32 %v1786_v25, %v1554_v44 }
 0x5ac   :  { %v1536_v54 = vsel %vm1535_vm10, %v1784_v18, %v1532_v5 }
 0x5ad   :  { %v1541_v56 = vsel %vm1538_vm11, %v1540_v15, %v1536_v54  ;;  %v1559_v13 = vsel %vm1558_vm14, %v1786_v25, %v1555_v51 }
 0x5ae   :  { %v1567_v52 = vmul.f32 %v1566_v61, %v1541_v56  ;;  %v1564_v27 = vsel %vm1561_vm15, %v1563_v22, %v1559_v13 }
 0x5af   :  { %v1572_v33 = vsub.f32 1.0, %v1564_v27  ;;  %v1574_v17 = vmul.f32 %v1564_v27, %v2727_v57 }
 0x5b0   :  { %v1570_v8 = vadd.f32 %v1568_v2, %v1567_v52 }
 0x5b2   :  { %1787 = vtanh.f32 %v1570_v8 }
 0x5b8   :  { %v1788_v20 = vpop.eup %1787 }
 0x5b9   :  { %v1573_v38 = vmul.f32 %v1788_v20, %v1572_v33 }
 0x5bb   :  { %v1575_v31 = vadd.f32 %v1574_v17, %v1573_v38 }
 0x5bd   :  { %1576 = vst [vmem:[#allocation4 + $0x7] sm:$0x1] %v1575_v31 }
 0x5be   :  { %1577 = vst [vmem:[#allocation16] sm:$0x1] %v1575_v31 }
 0x5bf   :  { %1651 = dma.vmem_to_hbm [thread:$0]  %s1647_s17, 16, %s1649_s18, [#allocation17]  }
 0x5c4   :  { %v1578_v39 = vld [vmem:[#allocation4] sm:$0xff] }
 0x5c5   :  { %1615 = vmatmul.f32.vlgmr.msra.gmra.mxu3 %v1578_v39 }
 0x648   :  { %v1616_v48 = vpop.f32.mrf.mxu3 }
 0x649   :  { %v1617_v50 = vadd.f32 %v1708_v41, %v1616_v48 }
 0x64b   :  { %1619 = vmax.xlane.f32.xlu0 %v1617_v50 }
 0x6be   :  { %v1620_v53 = vpop.xlane.xlu0 %1619 }
 0x6bf   :  { %v1621_v1 = vsub.f32 %v1617_v50, %v1620_v53 }
 0x6c1   :  { %v1622_v23 = vmul.f32 1.442695, %v1621_v1 }
 0x6c3   :  { %1789 = vpow2.f32 %v1622_v23 }
 0x6c9   :  { %v1790_v26 = vpop.eup %1789 }
 0x6ca   :  { %1624 = vadd.xlane.f32.xlu0 %v1790_v26 }
 0x73d   :  { %v1625_v57 = vpop.xlane.xlu0 %1624 }
 0x73e   :  { %1791 = vlog2.f32 %v1625_v57 }
 0x744   :  { %v1792_v29 = vpop.eup %1791 }
 0x745   :  { %v1627_v40 = vmul.f32 0.6931472, %v1792_v29 }
 0x747   :  { %v1628_v36 = vsub.f32 %v1621_v1, %v1627_v40 }
 0x749   :  { %1629 = vst [vmem:[#allocation15] sm:$0xff] %v1628_v36 }
 0x74a   :  { %1640 = dma.vmem_to_hbm [thread:$0]  %s1636_s19, 128, %s1638_s22, [#allocation7]  }
 0x74b   :  { %1958 = dma.done.wait [#allocation7], 128  }
 0x74c   :  { %1959 = vsyncadd [#allocation7], 4294967168 }
 0x74d   :  { %1960 = dma.done.wait [#allocation17], 16  }
 0x74e   :  { %1961 = vsyncadd [#allocation17], 4294967280 }
 0x74f   :  { %1660 = vsyncpa [#allocation6], 1 }
 0x750   :  { %1661 = vsyncpa [#allocation11], 1 }
 0x751   :  { %1662 = vsyncpa [#allocation14], 1 }
 0x752   :  { %1663 = vsyncpa [#allocation7], 1 }
 0x753   :  { %1664 = vsyncpa [#allocation17], 1 }
 0x754   :  { %1665 = vsyncpa [#allocation8], 1 }

</bundles_post_ra>
